<compile_context>
chip_gen: v5e
topology: v5e:2x2
jax: 0.10.0
libtpu: 0.0.40
codegen_flags: <defaults>
</compile_context>

<pallas_src>
import numpy as np
import jax
import jax.numpy as jnp
from jax.experimental import pallas as pl
from jax.experimental.pallas import tpu as pltpu

# ---------------- static problem configuration (small, synthetic) ----------------
N, C_IN, H, W = 2, 4, 16, 16          # input: (N, C_IN, H, W) NCHW
C_OUT = 8                              # ConvGroup(channels_in=4, channels_out=8)
HP, WP = H // 2, W // 2                # after MaxPool2d(2)
BN_EPS = 1e-12                         # BatchNorm eps from the module

K1 = 3 * N * (W + 2) * C_IN            # 432: conv1 fused contraction (dy, n, w_pad, c)
K1P = ((K1 + 127) // 128) * 128        # 512: padded to a multiple of 128
L1 = N * W * C_OUT                     # 256: conv1 output lanes (n, w, o)
LP = N * WP * C_OUT                    # 128: pooled lanes        (n, j, o)
K2 = 3 * LP                            # 384: conv2 fused contraction (= 3 * 128)
INV_CNT = 1.0 / float(N * HP * WP)     # BatchNorm per-channel element count


# ----------------------------- in-kernel helpers ---------------------------------
def _erf(x):
    # TODO(synk): no guaranteed Mosaic lowering for an exact erf primitive; use
    # Abramowitz & Stegun 7.1.26 (|abs err| < 1.5e-7, i.e. f32 noise level).
    a1, a2, a3, a4, a5 = 0.254829592, -0.284496736, 1.421413741, -1.453152027, 1.061405429
    p = 0.3275911
    ax = jnp.abs(x)
    t = 1.0 / (1.0 + p * ax)
    poly = ((((a5 * t + a4) * t + a3) * t + a2) * t + a1) * t
    y = 1.0 - poly * jnp.exp(-ax * ax)
    return jnp.where(x >= 0, y, -y)


def _gelu(x):
    # nn.GELU() default = exact (erf-based) GELU
    return 0.5 * x * (1.0 + _erf(x * (1.0 / np.sqrt(2.0))))


# --------------------------------- the kernel ------------------------------------
def convgroup_kernel(a1_ref, m1_ref, sw_ref, se_ref, so_ref, su_ref, sd_ref,
                     m2_ref, p_ref, o_ref):
    # a1_ref : (H, K1P)       conv1 LHS, batch+dy fused into K (built in the wrapper)
    # m1_ref : (K1P, L1)      banded conv1 weights (block-diagonal over n)
    # sw_ref : (L1-C_OUT, LP) even-width pool selector
    # se_ref : (HP, H)        even-row pool selector        so_ref: odd-row selector
    # su_ref : (HP, HP)       row shift up   (row i <- i-1, zero at i=0)
    # sd_ref : (HP, HP)       row shift down (row i <- i+1, zero at i=HP-1)
    # m2_ref : (K2, LP)       banded conv2 weights, width 'same' padding baked in
    # p_ref  : (LP, LP)       channel-mean broadcast matrix (1/count folded in)
    # o_ref  : (HP, LP)       lane-dense (8, 128) output
    f32 = jnp.float32
    P = p_ref[...]

    def bn_gelu(y):
        # train-mode BatchNorm2d (weight=1, bias=0, biased batch variance) + GELU.
        # One (1,LP)@(LP,LP) dot per statistic: reduce-to-channel AND broadcast-back
        # are fused into P (1/count included), so no per-channel intermediates.
        mean_f = jnp.dot(jnp.sum(y, axis=0, keepdims=True), P,
                         preferred_element_type=f32)                  # (1, LP)
        d = y - mean_f
        var_f = jnp.dot(jnp.sum(d * d, axis=0, keepdims=True), P,
                        preferred_element_type=f32)                   # (1, LP)
        return _gelu(d * jax.lax.rsqrt(var_f + BN_EPS))

    # ---- conv1 (3x3 'same', no bias): one fused matmul over (batch, dy) ----
    y1 = jnp.dot(a1_ref[...], m1_ref[...], preferred_element_type=f32)     # (H, L1)

    # ---- MaxPool2d(2): width pairwise-max + even-w selector, then row selectors ----
    tw = jnp.maximum(y1[:, :L1 - C_OUT], y1[:, C_OUT:])                    # (H, L1-8)
    tws = jnp.dot(tw, sw_ref[...], preferred_element_type=f32)             # (H, LP)
    pooled = jnp.maximum(
        jnp.dot(se_ref[...], tws, preferred_element_type=f32),
        jnp.dot(so_ref[...], tws, preferred_element_type=f32))             # (HP, LP)

    # ---- BatchNorm1 + GELU ----
    g1 = bn_gelu(pooled)                                                   # (HP, LP)

    # ---- conv2 (3x3 'same', no bias): one fused matmul, no scratch roundtrip ----
    g1_up = jnp.dot(su_ref[...], g1, preferred_element_type=f32)           # row i -> g1[i-1]
    g1_dn = jnp.dot(sd_ref[...], g1, preferred_element_type=f32)           # row i -> g1[i+1]
    lhs2 = jnp.concatenate([g1_up, g1, g1_dn], axis=1)                     # (HP, K2)
    y2 = jnp.dot(lhs2, m2_ref[...], preferred_element_type=f32)            # (HP, LP)

    # ---- BatchNorm2 + GELU ----
    o_ref[...] = bn_gelu(y2)                                               # unmasked (8,128) store


# -------------------------- wrapper-side parameter glue --------------------------
def _conv1_banded(w1):
    """w1: (C_OUT, C_IN, 3, 3).  Banded matrix so that conv1 output row h (all images,
    all columns) = A1[h] @ m, with A1 lanes = (dy, n, w_pad, c) and out lanes = (n, w, o)."""
    w1 = np.asarray(w1, np.float32)
    m = np.zeros((K1P, L1), np.float32)
    row_sz = (W + 2) * C_IN
    for dy in range(3):
        for dx in range(3):
            for n in range(N):
                for w in range(W):
                    for c in range(C_IN):
                        for o in range(C_OUT):
                            k = dy * N * row_sz + n * row_sz + (w + dx) * C_IN + c
                            l = n * W * C_OUT + w * C_OUT + o
                            m[k, l] = w1[o, c, dy, dx]
    return m


def _conv2_banded(w2):
    """w2: (C_OUT, C_OUT, 3, 3).  Width 'same' padding baked in (out-of-range dx taps
    dropped).  LHS lanes = (dy, n, jp, c), out lanes = (n, j, o)."""
    w2 = np.asarray(w2, np.float32)
    m = np.zeros((K2, LP), np.float32)
    for dy in range(3):
        for dx in range(3):
            for n in range(N):
                for j in range(WP):
                    jp = j + dx - 1
                    if jp < 0 or jp >= WP:
                        continue
                    for c in range(C_OUT):
                        for o in range(C_OUT):
                            k = dy * LP + n * WP * C_OUT + jp * C_OUT + c
                            l = n * WP * C_OUT + j * C_OUT + o
                            m[k, l] = w2[o, c, dy, dx]
    return m


def _selector_matrices():
    sw = np.zeros((L1 - C_OUT, LP), np.float32)          # even-width pool selector
    for n in range(N):
        for j in range(WP):
            for o in range(C_OUT):
                sw[n * W * C_OUT + 2 * j * C_OUT + o, n * WP * C_OUT + j * C_OUT + o] = 1.0
    se = np.zeros((HP, H), np.float32)                   # even / odd row pool selectors
    so = np.zeros((HP, H), np.float32)
    for i in range(HP):
        se[i, 2 * i] = 1.0
        so[i, 2 * i + 1] = 1.0
    su = np.eye(HP, k=-1, dtype=np.float32)              # row i <- row i-1 (zero at i=0)
    sd = np.eye(HP, k=1, dtype=np.float32)               # row i <- row i+1 (zero at i=HP-1)
    r = np.zeros((LP, C_OUT), np.float32)                # fused-lane -> per-channel reduce
    for l in range(LP):
        r[l, l % C_OUT] = 1.0
    p = (r @ r.T) * INV_CNT                              # fused reduce+broadcast (128,128)
    return sw, se, so, su, sd, p


def _conv1_lhs(x_nchw):
    """Build the conv1 LHS: (H, K1P), lanes = (dy, n, w_pad, c), zero-padded to K1P."""
    x = jnp.transpose(x_nchw, (0, 2, 3, 1)).astype(jnp.float32)      # NHWC
    x = jnp.pad(x, ((0, 0), (1, 1), (1, 1), (0, 0)))                 # (N, H+2, W+2, C_IN)
    slabs = []
    for dy in range(3):
        s = jnp.transpose(x[:, dy:dy + H], (1, 0, 2, 3))             # (H, N, W+2, C_IN)
        slabs.append(s.reshape(H, N * (W + 2) * C_IN))
    a1 = jnp.concatenate(slabs, axis=1)                              # (H, K1)
    return jnp.pad(a1, ((0, 0), (0, K1P - K1)))                      # (H, K1P)


def conv_group_forward(x_nchw, w1, w2):
    """x_nchw: (N, C_IN, H, W); w1: (C_OUT, C_IN, 3, 3); w2: (C_OUT, C_OUT, 3, 3).
    Returns (N, C_OUT, H//2, W//2) NCHW, matching ConvGroup.forward (training mode)."""
    a1 = _conv1_lhs(x_nchw)
    m1f = _conv1_banded(w1)
    m2f = _conv2_banded(w2)
    sw, se, so, su, sd, p = _selector_matrices()

    out = pl.pallas_call(
        convgroup_kernel,
        out_shape=jax.ShapeDtypeStruct((HP, LP), jnp.float32),       # lane-dense (8, 128)
        in_specs=[pl.BlockSpec(memory_space=pltpu.MemorySpace.VMEM)] * 9,
        out_specs=pl.BlockSpec(memory_space=pltpu.MemorySpace.VMEM),
    )(a1, jnp.asarray(m1f), jnp.asarray(sw), jnp.asarray(se), jnp.asarray(so),
      jnp.asarray(su), jnp.asarray(sd), jnp.asarray(m2f), jnp.asarray(p))

    # wrapper-side layout plumbing back to NCHW: rows = i, lanes = (n, j, o)
    out = out.reshape(HP, N, WP, C_OUT)
    return jnp.transpose(out, (1, 3, 0, 2))


# ------------------------- pure-JAX reference (same math) -------------------------
def _reference(x, w1, w2):
    hi = jax.lax.Precision.HIGHEST

    def conv(y, w):
        return jax.lax.conv_general_dilated(
            y, w, window_strides=(1, 1), padding='SAME',
            dimension_numbers=('NCHW', 'OIHW', 'NCHW'), precision=hi)

    def bn_gelu(y):
        mean = jnp.mean(y, axis=(0, 2, 3), keepdims=True)
        var = jnp.mean((y - mean) ** 2, axis=(0, 2, 3), keepdims=True)   # biased
        return jax.nn.gelu((y - mean) * jax.lax.rsqrt(var + BN_EPS), approximate=False)

    y = conv(x, w1)
    y = jax.lax.reduce_window(y, -jnp.inf, jax.lax.max,
                              (1, 1, 2, 2), (1, 1, 2, 2), 'VALID')
    y = bn_gelu(y)
    y = conv(y, w2)
    return bn_gelu(y)


# ------------------------------------- main ---------------------------------------
if __name__ == "__main__":
    key = jax.random.PRNGKey(0)
    kx, k1, k2 = jax.random.split(key, 3)

    # deterministic synthetic input + conv weights (Conv2d weight shapes, bias=False)
    x = jax.random.normal(kx, (N, C_IN, H, W), dtype=jnp.float32)
    w1 = jax.random.normal(k1, (C_OUT, C_IN, 3, 3), dtype=jnp.float32) * 0.1
    w2 = jax.random.normal(k2, (C_OUT, C_OUT, 3, 3), dtype=jnp.float32) * 0.1

    y = jax.block_until_ready(conv_group_forward(x, w1, w2))

    assert y.shape == (N, C_OUT, HP, WP), y.shape
    assert bool(jnp.all(jnp.isfinite(y)))

    # numerical sanity check vs. a pure-JAX reference (lenient threshold to allow
    # for MXU pass precision; layout/semantics bugs would show O(1) errors)
    y_ref = jax.block_until_ready(_reference(x, w1, w2))
    max_err = float(jnp.max(jnp.abs(y - y_ref)))
    assert max_err < 0.15, f"max abs err vs reference = {max_err}"

    print("KERNEL_OK")
</pallas_src>

<mosaic_0001>
module attributes {stable_mosaic.version = 11 : i64} {
  func.func @convgroup_kernel(%arg0: memref<16x512xf32, #tpu.memory_space<vmem>>, %arg1: memref<512x256xf32, #tpu.memory_space<vmem>>, %arg2: memref<248x128xf32, #tpu.memory_space<vmem>>, %arg3: memref<8x16xf32, #tpu.memory_space<vmem>>, %arg4: memref<8x16xf32, #tpu.memory_space<vmem>>, %arg5: memref<8x8xf32, #tpu.memory_space<vmem>>, %arg6: memref<8x8xf32, #tpu.memory_space<vmem>>, %arg7: memref<384x128xf32, #tpu.memory_space<vmem>>, %arg8: memref<128x128xf32, #tpu.memory_space<vmem>>, %arg9: memref<8x128xf32, #tpu.memory_space<vmem>>) attributes {dimension_semantics = [], scalar_prefetch = 0 : i64, scratch_operands = 0 : i64, tpu.core_type = #tpu.core_type<tc>} {
    %c0 = arith.constant 0 : index
    %c0_0 = arith.constant 0 : index
    %0 = vector.load %arg8[%c0, %c0_0] : memref<128x128xf32, #tpu.memory_space<vmem>>, vector<128x128xf32>
    %c0_1 = arith.constant 0 : index
    %c0_2 = arith.constant 0 : index
    %1 = vector.load %arg0[%c0_1, %c0_2] : memref<16x512xf32, #tpu.memory_space<vmem>>, vector<16x512xf32>
    %c0_3 = arith.constant 0 : index
    %c0_4 = arith.constant 0 : index
    %2 = vector.load %arg1[%c0_3, %c0_4] : memref<512x256xf32, #tpu.memory_space<vmem>>, vector<512x256xf32>
    %cst = arith.constant dense<0.000000e+00> : vector<16x256xf32>
    %3 = tpu.matmul %1, %2, %cst {dimension_numbers = #tpu.dot_dimension_numbers<[1], [0], [0], [1], [0, 0, 1, 1], [], []>} : vector<16x512xf32>, vector<512x256xf32>, vector<16x256xf32> -> vector<16x256xf32>
    %4 = vector.extract_strided_slice %3 {offsets = [0, 0], sizes = [16, 248], strides = [1, 1]} : vector<16x256xf32> to vector<16x248xf32>
    %5 = vector.extract_strided_slice %3 {offsets = [0, 8], sizes = [16, 248], strides = [1, 1]} : vector<16x256xf32> to vector<16x248xf32>
    %6 = arith.maximumf %4, %5 : vector<16x248xf32>
    %c0_5 = arith.constant 0 : index
    %c0_6 = arith.constant 0 : index
    %7 = vector.load %arg2[%c0_5, %c0_6] : memref<248x128xf32, #tpu.memory_space<vmem>>, vector<248x128xf32>
    %cst_7 = arith.constant dense<0.000000e+00> : vector<16x128xf32>
    %8 = tpu.matmul %6, %7, %cst_7 {dimension_numbers = #tpu.dot_dimension_numbers<[1], [0], [0], [1], [0, 0, 1, 1], [], []>} : vector<16x248xf32>, vector<248x128xf32>, vector<16x128xf32> -> vector<16x128xf32>
    %c0_8 = arith.constant 0 : index
    %c0_9 = arith.constant 0 : index
    %9 = vector.load %arg3[%c0_8, %c0_9] : memref<8x16xf32, #tpu.memory_space<vmem>>, vector<8x16xf32>
    %cst_10 = arith.constant dense<0.000000e+00> : vector<8x128xf32>
    %10 = tpu.matmul %9, %8, %cst_10 {dimension_numbers = #tpu.dot_dimension_numbers<[1], [0], [0], [1], [0, 0, 1, 1], [], []>} : vector<8x16xf32>, vector<16x128xf32>, vector<8x128xf32> -> vector<8x128xf32>
    %c0_11 = arith.constant 0 : index
    %c0_12 = arith.constant 0 : index
    %11 = vector.load %arg4[%c0_11, %c0_12] : memref<8x16xf32, #tpu.memory_space<vmem>>, vector<8x16xf32>
    %cst_13 = arith.constant dense<0.000000e+00> : vector<8x128xf32>
    %12 = tpu.matmul %11, %8, %cst_13 {dimension_numbers = #tpu.dot_dimension_numbers<[1], [0], [0], [1], [0, 0, 1, 1], [], []>} : vector<8x16xf32>, vector<16x128xf32>, vector<8x128xf32> -> vector<8x128xf32>
    %13 = arith.maximumf %10, %12 : vector<8x128xf32>
    %cst_14 = arith.constant dense<0.000000e+00> : vector<128xf32>
    %14 = vector.multi_reduction <add>, %13, %cst_14 [0] : vector<8x128xf32> to vector<128xf32>
    %15 = vector.shape_cast %14 : vector<128xf32> to vector<1x128xf32>
    %cst_15 = arith.constant dense<0.000000e+00> : vector<1x128xf32>
    %16 = tpu.matmul %15, %0, %cst_15 {dimension_numbers = #tpu.dot_dimension_numbers<[1], [0], [0], [1], [0, 0, 1, 1], [], []>} : vector<1x128xf32>, vector<128x128xf32>, vector<1x128xf32> -> vector<1x128xf32>
    %17 = vector.broadcast %16 : vector<1x128xf32> to vector<8x128xf32>
    %18 = arith.subf %13, %17 : vector<8x128xf32>
    %19 = arith.mulf %18, %18 : vector<8x128xf32>
    %cst_16 = arith.constant dense<0.000000e+00> : vector<128xf32>
    %20 = vector.multi_reduction <add>, %19, %cst_16 [0] : vector<8x128xf32> to vector<128xf32>
    %21 = vector.shape_cast %20 : vector<128xf32> to vector<1x128xf32>
    %cst_17 = arith.constant dense<0.000000e+00> : vector<1x128xf32>
    %22 = tpu.matmul %21, %0, %cst_17 {dimension_numbers = #tpu.dot_dimension_numbers<[1], [0], [0], [1], [0, 0, 1, 1], [], []>} : vector<1x128xf32>, vector<128x128xf32>, vector<1x128xf32> -> vector<1x128xf32>
    %cst_18 = arith.constant 9.99999996E-13 : f32
    %23 = vector.broadcast %cst_18 : f32 to vector<1x128xf32>
    %24 = arith.addf %22, %23 : vector<1x128xf32>
    %25 = math.rsqrt %24 : vector<1x128xf32>
    %26 = vector.broadcast %25 : vector<1x128xf32> to vector<8x128xf32>
    %27 = arith.mulf %18, %26 : vector<8x128xf32>
    %cst_19 = arith.constant 5.000000e-01 : f32
    %28 = vector.broadcast %cst_19 : f32 to vector<8x128xf32>
    %29 = arith.mulf %28, %27 : vector<8x128xf32>
    %cst_20 = arith.constant 0.707106769 : f32
    %30 = vector.broadcast %cst_20 : f32 to vector<8x128xf32>
    %31 = arith.mulf %27, %30 : vector<8x128xf32>
    %32 = math.absf %31 : vector<8x128xf32>
    %cst_21 = arith.constant 0.327591091 : f32
    %33 = vector.broadcast %cst_21 : f32 to vector<8x128xf32>
    %34 = arith.mulf %33, %32 : vector<8x128xf32>
    %cst_22 = arith.constant 1.000000e+00 : f32
    %35 = vector.broadcast %cst_22 : f32 to vector<8x128xf32>
    %36 = arith.addf %35, %34 : vector<8x128xf32>
    %cst_23 = arith.constant 1.000000e+00 : f32
    %37 = vector.broadcast %cst_23 : f32 to vector<8x128xf32>
    %38 = arith.divf %37, %36 : vector<8x128xf32>
    %cst_24 = arith.constant 1.06140542 : f32
    %39 = vector.broadcast %cst_24 : f32 to vector<8x128xf32>
    %40 = arith.mulf %39, %38 : vector<8x128xf32>
    %cst_25 = arith.constant -1.45315206 : f32
    %41 = vector.broadcast %cst_25 : f32 to vector<8x128xf32>
    %42 = arith.addf %40, %41 : vector<8x128xf32>
    %43 = arith.mulf %42, %38 : vector<8x128xf32>
    %cst_26 = arith.constant 1.42141378 : f32
    %44 = vector.broadcast %cst_26 : f32 to vector<8x128xf32>
    %45 = arith.addf %43, %44 : vector<8x128xf32>
    %46 = arith.mulf %45, %38 : vector<8x128xf32>
    %cst_27 = arith.constant -0.284496725 : f32
    %47 = vector.broadcast %cst_27 : f32 to vector<8x128xf32>
    %48 = arith.addf %46, %47 : vector<8x128xf32>
    %49 = arith.mulf %48, %38 : vector<8x128xf32>
    %cst_28 = arith.constant 0.254829586 : f32
    %50 = vector.broadcast %cst_28 : f32 to vector<8x128xf32>
    %51 = arith.addf %49, %50 : vector<8x128xf32>
    %52 = arith.mulf %51, %38 : vector<8x128xf32>
    %cst_29 = arith.constant 0.000000e+00 : f32
    %53 = vector.broadcast %cst_29 : f32 to vector<8x128xf32>
    %54 = arith.subf %53, %32 : vector<8x128xf32>
    %55 = arith.mulf %54, %32 : vector<8x128xf32>
    %56 = math.exp %55 : vector<8x128xf32>
    %57 = arith.mulf %52, %56 : vector<8x128xf32>
    %cst_30 = arith.constant 1.000000e+00 : f32
    %58 = vector.broadcast %cst_30 : f32 to vector<8x128xf32>
    %59 = arith.subf %58, %57 : vector<8x128xf32>
    %cst_31 = arith.constant 0.000000e+00 : f32
    %60 = vector.broadcast %cst_31 : f32 to vector<8x128xf32>
    %61 = arith.cmpf oge, %31, %60 : vector<8x128xf32>
    %cst_32 = arith.constant 0.000000e+00 : f32
    %62 = vector.broadcast %cst_32 : f32 to vector<8x128xf32>
    %63 = arith.subf %62, %59 : vector<8x128xf32>
    %64 = arith.select %61, %59, %63 : vector<8x128xi1>, vector<8x128xf32>
    %cst_33 = arith.constant 1.000000e+00 : f32
    %65 = vector.broadcast %cst_33 : f32 to vector<8x128xf32>
    %66 = arith.addf %65, %64 : vector<8x128xf32>
    %67 = arith.mulf %29, %66 : vector<8x128xf32>
    %c0_34 = arith.constant 0 : index
    %c0_35 = arith.constant 0 : index
    %68 = vector.load %arg5[%c0_34, %c0_35] : memref<8x8xf32, #tpu.memory_space<vmem>>, vector<8x8xf32>
    %cst_36 = arith.constant dense<0.000000e+00> : vector<8x128xf32>
    %69 = tpu.matmul %68, %67, %cst_36 {dimension_numbers = #tpu.dot_dimension_numbers<[1], [0], [0], [1], [0, 0, 1, 1], [], []>} : vector<8x8xf32>, vector<8x128xf32>, vector<8x128xf32> -> vector<8x128xf32>
    %c0_37 = arith.constant 0 : index
    %c0_38 = arith.constant 0 : index
    %70 = vector.load %arg6[%c0_37, %c0_38] : memref<8x8xf32, #tpu.memory_space<vmem>>, vector<8x8xf32>
    %cst_39 = arith.constant dense<0.000000e+00> : vector<8x128xf32>
    %71 = tpu.matmul %70, %67, %cst_39 {dimension_numbers = #tpu.dot_dimension_numbers<[1], [0], [0], [1], [0, 0, 1, 1], [], []>} : vector<8x8xf32>, vector<8x128xf32>, vector<8x128xf32> -> vector<8x128xf32>
    %72 = tpu.concatenate %69, %67, %71 in 1 : vector<8x128xf32>, vector<8x128xf32>, vector<8x128xf32> -> vector<8x384xf32>
    %c0_40 = arith.constant 0 : index
    %c0_41 = arith.constant 0 : index
    %73 = vector.load %arg7[%c0_40, %c0_41] : memref<384x128xf32, #tpu.memory_space<vmem>>, vector<384x128xf32>
    %cst_42 = arith.constant dense<0.000000e+00> : vector<8x128xf32>
    %74 = tpu.matmul %72, %73, %cst_42 {dimension_numbers = #tpu.dot_dimension_numbers<[1], [0], [0], [1], [0, 0, 1, 1], [], []>} : vector<8x384xf32>, vector<384x128xf32>, vector<8x128xf32> -> vector<8x128xf32>
    %cst_43 = arith.constant dense<0.000000e+00> : vector<128xf32>
    %75 = vector.multi_reduction <add>, %74, %cst_43 [0] : vector<8x128xf32> to vector<128xf32>
    %76 = vector.shape_cast %75 : vector<128xf32> to vector<1x128xf32>
    %cst_44 = arith.constant dense<0.000000e+00> : vector<1x128xf32>
    %77 = tpu.matmul %76, %0, %cst_44 {dimension_numbers = #tpu.dot_dimension_numbers<[1], [0], [0], [1], [0, 0, 1, 1], [], []>} : vector<1x128xf32>, vector<128x128xf32>, vector<1x128xf32> -> vector<1x128xf32>
    %78 = vector.broadcast %77 : vector<1x128xf32> to vector<8x128xf32>
    %79 = arith.subf %74, %78 : vector<8x128xf32>
    %80 = arith.mulf %79, %79 : vector<8x128xf32>
    %cst_45 = arith.constant dense<0.000000e+00> : vector<128xf32>
    %81 = vector.multi_reduction <add>, %80, %cst_45 [0] : vector<8x128xf32> to vector<128xf32>
    %82 = vector.shape_cast %81 : vector<128xf32> to vector<1x128xf32>
    %cst_46 = arith.constant dense<0.000000e+00> : vector<1x128xf32>
    %83 = tpu.matmul %82, %0, %cst_46 {dimension_numbers = #tpu.dot_dimension_numbers<[1], [0], [0], [1], [0, 0, 1, 1], [], []>} : vector<1x128xf32>, vector<128x128xf32>, vector<1x128xf32> -> vector<1x128xf32>
    %cst_47 = arith.constant 9.99999996E-13 : f32
    %84 = vector.broadcast %cst_47 : f32 to vector<1x128xf32>
    %85 = arith.addf %83, %84 : vector<1x128xf32>
    %86 = math.rsqrt %85 : vector<1x128xf32>
    %87 = vector.broadcast %86 : vector<1x128xf32> to vector<8x128xf32>
    %88 = arith.mulf %79, %87 : vector<8x128xf32>
    %cst_48 = arith.constant 5.000000e-01 : f32
    %89 = vector.broadcast %cst_48 : f32 to vector<8x128xf32>
    %90 = arith.mulf %89, %88 : vector<8x128xf32>
    %cst_49 = arith.constant 0.707106769 : f32
    %91 = vector.broadcast %cst_49 : f32 to vector<8x128xf32>
    %92 = arith.mulf %88, %91 : vector<8x128xf32>
    %93 = math.absf %92 : vector<8x128xf32>
    %cst_50 = arith.constant 0.327591091 : f32
    %94 = vector.broadcast %cst_50 : f32 to vector<8x128xf32>
    %95 = arith.mulf %94, %93 : vector<8x128xf32>
    %cst_51 = arith.constant 1.000000e+00 : f32
    %96 = vector.broadcast %cst_51 : f32 to vector<8x128xf32>
    %97 = arith.addf %96, %95 : vector<8x128xf32>
    %cst_52 = arith.constant 1.000000e+00 : f32
    %98 = vector.broadcast %cst_52 : f32 to vector<8x128xf32>
    %99 = arith.divf %98, %97 : vector<8x128xf32>
    %cst_53 = arith.constant 1.06140542 : f32
    %100 = vector.broadcast %cst_53 : f32 to vector<8x128xf32>
    %101 = arith.mulf %100, %99 : vector<8x128xf32>
    %cst_54 = arith.constant -1.45315206 : f32
    %102 = vector.broadcast %cst_54 : f32 to vector<8x128xf32>
    %103 = arith.addf %101, %102 : vector<8x128xf32>
    %104 = arith.mulf %103, %99 : vector<8x128xf32>
    %cst_55 = arith.constant 1.42141378 : f32
    %105 = vector.broadcast %cst_55 : f32 to vector<8x128xf32>
    %106 = arith.addf %104, %105 : vector<8x128xf32>
    %107 = arith.mulf %106, %99 : vector<8x128xf32>
    %cst_56 = arith.constant -0.284496725 : f32
    %108 = vector.broadcast %cst_56 : f32 to vector<8x128xf32>
    %109 = arith.addf %107, %108 : vector<8x128xf32>
    %110 = arith.mulf %109, %99 : vector<8x128xf32>
    %cst_57 = arith.constant 0.254829586 : f32
    %111 = vector.broadcast %cst_57 : f32 to vector<8x128xf32>
    %112 = arith.addf %110, %111 : vector<8x128xf32>
    %113 = arith.mulf %112, %99 : vector<8x128xf32>
    %cst_58 = arith.constant 0.000000e+00 : f32
    %114 = vector.broadcast %cst_58 : f32 to vector<8x128xf32>
    %115 = arith.subf %114, %93 : vector<8x128xf32>
    %116 = arith.mulf %115, %93 : vector<8x128xf32>
    %117 = math.exp %116 : vector<8x128xf32>
    %118 = arith.mulf %113, %117 : vector<8x128xf32>
    %cst_59 = arith.constant 1.000000e+00 : f32
    %119 = vector.broadcast %cst_59 : f32 to vector<8x128xf32>
    %120 = arith.subf %119, %118 : vector<8x128xf32>
    %cst_60 = arith.constant 0.000000e+00 : f32
    %121 = vector.broadcast %cst_60 : f32 to vector<8x128xf32>
    %122 = arith.cmpf oge, %92, %121 : vector<8x128xf32>
    %cst_61 = arith.constant 0.000000e+00 : f32
    %123 = vector.broadcast %cst_61 : f32 to vector<8x128xf32>
    %124 = arith.subf %123, %120 : vector<8x128xf32>
    %125 = arith.select %122, %120, %124 : vector<8x128xi1>, vector<8x128xf32>
    %cst_62 = arith.constant 1.000000e+00 : f32
    %126 = vector.broadcast %cst_62 : f32 to vector<8x128xf32>
    %127 = arith.addf %126, %125 : vector<8x128xf32>
    %128 = arith.mulf %90, %127 : vector<8x128xf32>
    %c0_63 = arith.constant 0 : index
    %c0_64 = arith.constant 0 : index
    %129 = vector.load %arg9[%c0_63, %c0_64] : memref<8x128xf32, #tpu.memory_space<vmem>>, vector<8x128xf32>
    tpu.vector_store %arg9[%c0_63, %c0_64], %128 {strides = array<i32>} : memref<8x128xf32, #tpu.memory_space<vmem>>, vector<8x128xf32>,
    return
  }
}

</mosaic_0001>

<bundles_post_ra>
// kernel: tpu_custom_call.1
= control target key start
LH: loop header
LB: loop body
LE: loop exit
PB: predicated region body
PF: predicated region fallthrough
CT: control target
= control target key end

     0   :  { %14 = vsyncpa [#allocation3], 0  ;;  %s1574_s0 = inlined_call_operand.hbm [shape: f32[16,512], index: 0, kind: input, shape index: {}]   ;;  %s1575_s1 = inlined_call_operand.hbm [shape: f32[512,256], index: 1, kind: input, shape index: {}]   ;;  %s1576_s2 = inlined_call_operand.hbm [shape: f32[248,128], index: 2, kind: input, shape index: {}]   ;;  %s1577_s3 = inlined_call_operand.hbm [shape: f32[8,16], index: 3, kind: input, shape index: {}]   ;;  %s1578_s4 = inlined_call_operand.hbm [shape: f32[8,16], index: 4, kind: input, shape index: {}]   ;;  %s1579_s5 = inlined_call_operand.hbm [shape: f32[8,8], index: 5, kind: input, shape index: {}]   ;;  %s1580_s6 = inlined_call_operand.hbm [shape: f32[8,8], index: 6, kind: input, shape index: {}]   ;;  %s1581_s7 = inlined_call_operand.hbm [shape: f32[384,128], index: 7, kind: input, shape index: {}]   ;;  %s1582_s8 = inlined_call_operand.hbm [shape: f32[128,128], index: 8, kind: input, shape index: {}]   ;;  %s1583_s9 = inlined_call_operand.hbm [shape: f32[8,128], index: 9, kind: output, shape index: {}]  }
   0x1   :  { %15 = vsyncpa [#allocation6], 0 }
   0x2   :  { %16 = vsyncpa [#allocation9], 0 }
   0x3   :  { %17 = vsyncpa [#allocation12], 0 }
   0x4   :  { %18 = vsyncpa [#allocation15], 0  ;;  %s37_s11 = sshll.u32 %s1575_s1, 4  ;;  %s38_s11 = int_to_ptr.hbm [resolvable:$true] %s37_s11 }
   0x5   :  { %19 = vsyncpa [#allocation4], 0  ;;  %s1337_s12 = smov [#allocation5]   ;;  %s64_s16 = sshll.u32 %s1577_s3, 4  ;;  %s65_s16 = int_to_ptr.hbm [resolvable:$true] %s64_s16 }
   0x6   :  { %s39_s13 = sshll.u32 %s1337_s12, 4  ;;  %s1338_s17 = smov 256   ;;  %s40_s13 = int_to_ptr.vmem [resolvable:$true] %s39_s13 }
   0x7   :  { %s1339_s18 = smov 16   ;;  %s1340_s19 = smov [#allocation8]  }
   0x8   :  { %45 = dma.hbm_to_vmem [thread:$0]  %s38_s11, 16384, %s40_s13, [#allocation6], %s1338_s17, %s1338_s17, %s1339_s18  }
   0x9   :  { %s66_s20 = sshll.u32 %s1340_s19, 4  ;;  %s86_s23 = sshll.u32 %s1579_s5, 4  ;;  %s67_s20 = int_to_ptr.vmem [resolvable:$true] %s66_s20  ;;  %s87_s23 = int_to_ptr.hbm [resolvable:$true] %s86_s23 }
   0xa   :  { %69 = dma.hbm_to_vmem [thread:$0]  %s65_s16, 128, %s67_s20, [#allocation9]  }
   0xb   :  { %s1341_s1 = smov [#allocation11]   ;;  %s107_s3 = sshll.u32 %s1581_s7, 4  ;;  %s108_s3 = int_to_ptr.hbm [resolvable:$true] %s107_s3 }
   0xc   :  { %s88_s24 = sshll.u32 %s1341_s1, 4  ;;  %s1342_s27 = smov [#allocation14]   ;;  %s89_s24 = int_to_ptr.vmem [resolvable:$true] %s88_s24 }
   0xd   :  { %91 = dma.hbm_to_vmem [thread:$0]  %s87_s23, 128, %s89_s24, [#allocation12]  }
   0xe   :  { %s109_s28 = sshll.u32 %s1342_s27, 4  ;;  %s24_s10 = sshll.u32 %s1574_s0, 4  ;;  %s110_s28 = int_to_ptr.vmem [resolvable:$true] %s109_s28  ;;  %s25_s10 = int_to_ptr.hbm [resolvable:$true] %s24_s10 }
   0xf   :  { %s1343_s5 = smov 128   ;;  %s1344_s11 = smov 8  }
  0x10   :  { %115 = dma.hbm_to_vmem [thread:$0]  %s108_s3, 6144, %s110_s28, [#allocation15], %s1343_s5, %s1343_s5, %s1344_s11  }
  0x11   :  { %s1345_s12 = smov [#allocation2]   ;;  %s50_s15 = sshll.u32 %s1576_s2, 4  ;;  %s51_s15 = int_to_ptr.hbm [resolvable:$true] %s50_s15 }
  0x12   :  { %s26_s13 = sshll.u32 %s1345_s12, 4  ;;  %s1346_s16 = smov 512   ;;  %s27_s13 = int_to_ptr.vmem [resolvable:$true] %s26_s13 }
  0x13   :  { %s1347_s17 = smov 32   ;;  %s1348_s0 = smov [#allocation7]  }
  0x14   :  { %32 = dma.hbm_to_vmem [thread:$0]  %s25_s10, 1024, %s27_s13, [#allocation3], %s1346_s16, %s1346_s16, %s1347_s17  }
  0x15   :  { %s52_s18 = sshll.u32 %s1348_s0, 4  ;;  %s75_s21 = sshll.u32 %s1578_s4, 4  ;;  %s53_s18 = int_to_ptr.vmem [resolvable:$true] %s52_s18  ;;  %s76_s21 = int_to_ptr.hbm [resolvable:$true] %s75_s21 }
  0x16   :  { %58 = dma.hbm_to_vmem [thread:$0]  %s51_s15, 3968, %s53_s18, [#allocation6], %s1343_s5, %s1343_s5, %s1344_s11  }
  0x17   :  { %s97_s2 = sshll.u32 %s1580_s6, 4  ;;  %s1349_s1 = smov [#allocation10]   ;;  %s98_s2 = int_to_ptr.hbm [resolvable:$true] %s97_s2 }
  0x18   :  { %s77_s24 = sshll.u32 %s1349_s1, 4  ;;  %s1350_s25 = smov [#allocation13]   ;;  %s78_s24 = int_to_ptr.vmem [resolvable:$true] %s77_s24 }
  0x19   :  { %80 = dma.hbm_to_vmem [thread:$0]  %s76_s21, 128, %s78_s24, [#allocation9]  }
  0x1a   :  { %s99_s26 = sshll.u32 %s1350_s25, 4  ;;  %s120_s4 = sshll.u32 %s1582_s8, 4  ;;  %s100_s26 = int_to_ptr.vmem [resolvable:$true] %s99_s26  ;;  %s121_s4 = int_to_ptr.hbm [resolvable:$true] %s120_s4 }
  0x1b   :  { %102 = dma.hbm_to_vmem [thread:$0]  %s98_s2, 128, %s100_s26, [#allocation12]  }
  0x1c   :  { %s1351_s28 = smov [#allocation16]  }
  0x1d   :  { %s122_s29 = sshll.u32 %s1351_s28, 4  ;;  %s123_s29 = int_to_ptr.vmem [resolvable:$true] %s122_s29 }
  0x1e   :  { %128 = dma.hbm_to_vmem [thread:$0]  %s121_s4, 2048, %s123_s29, [#allocation15], %s1343_s5, %s1343_s5, %s1344_s11  }
  0x1f   :  { %1325 = dma.done.wait [#allocation3], 1024  }
  0x20   :  { %1326 = vsyncadd [#allocation3], 4294966272 }
  0x21   :  { %1327 = dma.done.wait [#allocation6], 20352  }
  0x22   :  { %1328 = vsyncadd [#allocation6], 4294946944 }
  0x23   :  { %1329 = dma.done.wait [#allocation9], 256  }
  0x24   :  { %1330 = vsyncadd [#allocation9], 4294967040 }
  0x25   :  { %1331 = dma.done.wait [#allocation12], 256  }
  0x26   :  { %1332 = vsyncadd [#allocation12], 4294967040 }
  0x27   :  { %1333 = dma.done.wait [#allocation15], 8192  }
  0x28   :  { %1334 = vsyncadd [#allocation15], 4294959104  ;;  %v283_v0 = vld [vmem:[#allocation5 + $0x2f0] sm:$0xff]  ;;  %v281_v1 = vld [vmem:[#allocation5 + $0x2e0] sm:$0xff]  ;;  %s1352_s6 = smov 120   ;;  %vm513_vm0 = vcmask 982016  }
  0x29   :  { %v315_v2 = vld [vmem:[#allocation5 + $0x3f0] sm:$0xff]  ;;  %363 = vmatpush.msra.mxu2 %v283_v0  ;;  %v313_v6 = vld [vmem:[#allocation5 + $0x3e0] sm:$0xff]  ;;  %v284_v62 = vld [vmem:[#allocation5 + $0x2f8] sm:$0xff]  ;;  %vm608_vm1 = vcmask 130048   ;;  %vm765_vm10 = vcmask 64512   ;;  %s1353_s8 = smov [#allocation17]  }
  0x2a   :  { %386 = vmatpush.msra.mxu3 %v315_v2  ;;  %v219_v3 = vld [vmem:[#allocation5 + $0xf0] sm:$0xff]  ;;  %v217_v7 = vld [vmem:[#allocation5 + $0xe0] sm:$0xff]  ;;  %v316_v63 = vld [vmem:[#allocation5 + $0x3f8] sm:$0xff]  ;;  %s1034_s30 = sshll.u32 %s1353_s8, 4  ;;  %s1036_s11 = sshll.u32 %s1583_s9, 4  ;;  %s1035_s30 = int_to_ptr.vmem [resolvable:$true] %s1034_s30  ;;  %s1037_s11 = int_to_ptr.hbm [resolvable:$true] %s1036_s11 }
  0x2b   :  { %v251_v4 = vld [vmem:[#allocation5 + $0x1f0] sm:$0xff]  ;;  %317 = vmatpush.msra.mxu0 %v219_v3  ;;  %v249_v8 = vld [vmem:[#allocation5 + $0x1e0] sm:$0xff]  ;;  %364 = vmatpush.msra.mxu2 %v281_v1  ;;  %v282_v2 = vld [vmem:[#allocation5 + $0x2e8] sm:$0xff] }
  0x2c   :  { %v279_v5 = vld [vmem:[#allocation5 + $0x2d0] sm:$0xff]  ;;  %340 = vmatpush.msra.mxu1 %v251_v4  ;;  %387 = vmatpush.msra.mxu3 %v313_v6  ;;  %v277_v11 = vld [vmem:[#allocation5 + $0x2c0] sm:$0xff]  ;;  %v220_v3 = vld [vmem:[#allocation5 + $0xf8] sm:$0xff] }
  0x2d   :  { %v311_v9 = vld [vmem:[#allocation5 + $0x3d0] sm:$0xff]  ;;  %318 = vmatpush.msra.mxu0 %v217_v7  ;;  %v309_v13 = vld [vmem:[#allocation5 + $0x3c0] sm:$0xff]  ;;  %365 = vmatpush.msra.mxu2 %v279_v5  ;;  %v252_v4 = vld [vmem:[#allocation5 + $0x1f8] sm:$0xff] }
  0x2e   :  { %v215_v10 = vld [vmem:[#allocation5 + $0xd0] sm:$0xff]  ;;  %341 = vmatpush.msra.mxu1 %v249_v8  ;;  %388 = vmatpush.msra.mxu3 %v311_v9  ;;  %v213_v14 = vld [vmem:[#allocation5 + $0xc0] sm:$0xff]  ;;  %v314_v5 = vld [vmem:[#allocation5 + $0x3e8] sm:$0xff] }
  0x2f   :  { %v247_v12 = vld [vmem:[#allocation5 + $0x1d0] sm:$0xff]  ;;  %v245_v15 = vld [vmem:[#allocation5 + $0x1c0] sm:$0xff]  ;;  %319 = vmatpush.msra.mxu0 %v215_v10  ;;  %366 = vmatpush.msra.mxu2 %v277_v11  ;;  %v280_v6 = vld [vmem:[#allocation5 + $0x2d8] sm:$0xff] }
  0x30   :  { %342 = vmatpush.msra.mxu1 %v247_v12  ;;  %v275_v16 = vld [vmem:[#allocation5 + $0x2b0] sm:$0xff]  ;;  %389 = vmatpush.msra.mxu3 %v309_v13  ;;  %v273_v20 = vld [vmem:[#allocation5 + $0x2a0] sm:$0xff]  ;;  %v218_v7 = vld [vmem:[#allocation5 + $0xe8] sm:$0xff] }
  0x31   :  { %v307_v17 = vld [vmem:[#allocation5 + $0x3b0] sm:$0xff]  ;;  %320 = vmatpush.msra.mxu0 %v213_v14  ;;  %v305_v21 = vld [vmem:[#allocation5 + $0x3a0] sm:$0xff]  ;;  %367 = vmatpush.msra.mxu2 %v275_v16  ;;  %v250_v8 = vld [vmem:[#allocation5 + $0x1e8] sm:$0xff] }
  0x32   :  { %v211_v18 = vld [vmem:[#allocation5 + $0xb0] sm:$0xff]  ;;  %343 = vmatpush.msra.mxu1 %v245_v15  ;;  %390 = vmatpush.msra.mxu3 %v307_v17  ;;  %v209_v22 = vld [vmem:[#allocation5 + $0xa0] sm:$0xff]  ;;  %v312_v9 = vld [vmem:[#allocation5 + $0x3d8] sm:$0xff] }
  0x33   :  { %v243_v19 = vld [vmem:[#allocation5 + $0x1b0] sm:$0xff]  ;;  %v241_v23 = vld [vmem:[#allocation5 + $0x1a0] sm:$0xff]  ;;  %321 = vmatpush.msra.mxu0 %v211_v18  ;;  %368 = vmatpush.msra.mxu2 %v273_v20  ;;  %v278_v10 = vld [vmem:[#allocation5 + $0x2c8] sm:$0xff] }
  0x34   :  { %344 = vmatpush.msra.mxu1 %v243_v19  ;;  %v271_v24 = vld [vmem:[#allocation5 + $0x290] sm:$0xff]  ;;  %391 = vmatpush.msra.mxu3 %v305_v21  ;;  %v269_v28 = vld [vmem:[#allocation5 + $0x280] sm:$0xff]  ;;  %v216_v11 = vld [vmem:[#allocation5 + $0xd8] sm:$0xff] }
  0x35   :  { %v303_v25 = vld [vmem:[#allocation5 + $0x390] sm:$0xff]  ;;  %322 = vmatpush.msra.mxu0 %v209_v22  ;;  %v301_v29 = vld [vmem:[#allocation5 + $0x380] sm:$0xff]  ;;  %369 = vmatpush.msra.mxu2 %v271_v24  ;;  %v248_v12 = vld [vmem:[#allocation5 + $0x1d8] sm:$0xff] }
  0x36   :  { %v207_v26 = vld [vmem:[#allocation5 + $0x90] sm:$0xff]  ;;  %345 = vmatpush.msra.mxu1 %v241_v23  ;;  %392 = vmatpush.msra.mxu3 %v303_v25  ;;  %v205_v30 = vld [vmem:[#allocation5 + $0x80] sm:$0xff]  ;;  %v310_v13 = vld [vmem:[#allocation5 + $0x3c8] sm:$0xff] }
  0x37   :  { %v239_v27 = vld [vmem:[#allocation5 + $0x190] sm:$0xff]  ;;  %v237_v31 = vld [vmem:[#allocation5 + $0x180] sm:$0xff]  ;;  %323 = vmatpush.msra.mxu0 %v207_v26  ;;  %370 = vmatpush.msra.mxu2 %v269_v28  ;;  %v276_v14 = vld [vmem:[#allocation5 + $0x2b8] sm:$0xff] }
  0x38   :  { %346 = vmatpush.msra.mxu1 %v239_v27  ;;  %v267_v32 = vld [vmem:[#allocation5 + $0x270] sm:$0xff]  ;;  %393 = vmatpush.msra.mxu3 %v301_v29  ;;  %v265_v36 = vld [vmem:[#allocation5 + $0x260] sm:$0xff]  ;;  %v214_v15 = vld [vmem:[#allocation5 + $0xc8] sm:$0xff] }
  0x39   :  { %v299_v33 = vld [vmem:[#allocation5 + $0x370] sm:$0xff]  ;;  %324 = vmatpush.msra.mxu0 %v205_v30  ;;  %v297_v37 = vld [vmem:[#allocation5 + $0x360] sm:$0xff]  ;;  %371 = vmatpush.msra.mxu2 %v267_v32  ;;  %v246_v16 = vld [vmem:[#allocation5 + $0x1c8] sm:$0xff] }
  0x3a   :  { %v203_v34 = vld [vmem:[#allocation5 + $0x70] sm:$0xff]  ;;  %347 = vmatpush.msra.mxu1 %v237_v31  ;;  %394 = vmatpush.msra.mxu3 %v299_v33  ;;  %v201_v38 = vld [vmem:[#allocation5 + $0x60] sm:$0xff]  ;;  %v308_v17 = vld [vmem:[#allocation5 + $0x3b8] sm:$0xff] }
  0x3b   :  { %v235_v35 = vld [vmem:[#allocation5 + $0x170] sm:$0xff]  ;;  %v233_v39 = vld [vmem:[#allocation5 + $0x160] sm:$0xff]  ;;  %325 = vmatpush.msra.mxu0 %v203_v34  ;;  %372 = vmatpush.msra.mxu2 %v265_v36  ;;  %v274_v18 = vld [vmem:[#allocation5 + $0x2a8] sm:$0xff] }
  0x3c   :  { %348 = vmatpush.msra.mxu1 %v235_v35  ;;  %v263_v40 = vld [vmem:[#allocation5 + $0x250] sm:$0xff]  ;;  %395 = vmatpush.msra.mxu3 %v297_v37  ;;  %v261_v44 = vld [vmem:[#allocation5 + $0x240] sm:$0xff]  ;;  %v212_v19 = vld [vmem:[#allocation5 + $0xb8] sm:$0xff] }
  0x3d   :  { %v295_v41 = vld [vmem:[#allocation5 + $0x350] sm:$0xff]  ;;  %326 = vmatpush.msra.mxu0 %v201_v38  ;;  %v293_v45 = vld [vmem:[#allocation5 + $0x340] sm:$0xff]  ;;  %373 = vmatpush.msra.mxu2 %v263_v40  ;;  %v244_v20 = vld [vmem:[#allocation5 + $0x1b8] sm:$0xff] }
  0x3e   :  { %v199_v42 = vld [vmem:[#allocation5 + $0x50] sm:$0xff]  ;;  %349 = vmatpush.msra.mxu1 %v233_v39  ;;  %396 = vmatpush.msra.mxu3 %v295_v41  ;;  %v197_v46 = vld [vmem:[#allocation5 + $0x40] sm:$0xff]  ;;  %v306_v21 = vld [vmem:[#allocation5 + $0x3a8] sm:$0xff] }
  0x3f   :  { %v231_v43 = vld [vmem:[#allocation5 + $0x150] sm:$0xff]  ;;  %v229_v47 = vld [vmem:[#allocation5 + $0x140] sm:$0xff]  ;;  %327 = vmatpush.msra.mxu0 %v199_v42  ;;  %374 = vmatpush.msra.mxu2 %v261_v44  ;;  %v272_v22 = vld [vmem:[#allocation5 + $0x298] sm:$0xff] }
  0x40   :  { %350 = vmatpush.msra.mxu1 %v231_v43  ;;  %v259_v48 = vld [vmem:[#allocation5 + $0x230] sm:$0xff]  ;;  %397 = vmatpush.msra.mxu3 %v293_v45  ;;  %v257_v52 = vld [vmem:[#allocation5 + $0x220] sm:$0xff]  ;;  %v210_v23 = vld [vmem:[#allocation5 + $0xa8] sm:$0xff] }
  0x41   :  { %v291_v49 = vld [vmem:[#allocation5 + $0x330] sm:$0xff]  ;;  %328 = vmatpush.msra.mxu0 %v197_v46  ;;  %v289_v53 = vld [vmem:[#allocation5 + $0x320] sm:$0xff]  ;;  %375 = vmatpush.msra.mxu2 %v259_v48  ;;  %v242_v24 = vld [vmem:[#allocation5 + $0x1a8] sm:$0xff] }
  0x42   :  { %v195_v50 = vld [vmem:[#allocation5 + $0x30] sm:$0xff]  ;;  %351 = vmatpush.msra.mxu1 %v229_v47  ;;  %398 = vmatpush.msra.mxu3 %v291_v49  ;;  %v193_v54 = vld [vmem:[#allocation5 + $0x20] sm:$0xff]  ;;  %v304_v25 = vld [vmem:[#allocation5 + $0x398] sm:$0xff] }
  0x43   :  { %v227_v51 = vld [vmem:[#allocation5 + $0x130] sm:$0xff]  ;;  %v225_v55 = vld [vmem:[#allocation5 + $0x120] sm:$0xff]  ;;  %329 = vmatpush.msra.mxu0 %v195_v50  ;;  %376 = vmatpush.msra.mxu2 %v257_v52  ;;  %v270_v26 = vld [vmem:[#allocation5 + $0x288] sm:$0xff] }
  0x44   :  { %352 = vmatpush.msra.mxu1 %v227_v51  ;;  %v255_v56 = vld [vmem:[#allocation5 + $0x210] sm:$0xff]  ;;  %399 = vmatpush.msra.mxu3 %v289_v53  ;;  %v253_v60 = vld [vmem:[#allocation5 + $0x200] sm:$0xff]  ;;  %v208_v27 = vld [vmem:[#allocation5 + $0x98] sm:$0xff] }
  0x45   :  { %v287_v57 = vld [vmem:[#allocation5 + $0x310] sm:$0xff]  ;;  %330 = vmatpush.msra.mxu0 %v193_v54  ;;  %v285_v61 = vld [vmem:[#allocation5 + $0x300] sm:$0xff]  ;;  %377 = vmatpush.msra.mxu2 %v255_v56  ;;  %v240_v29 = vld [vmem:[#allocation5 + $0x198] sm:$0xff] }
  0x46   :  { %v191_v58 = vld [vmem:[#allocation5 + $0x10] sm:$0xff]  ;;  %353 = vmatpush.msra.mxu1 %v225_v55  ;;  %400 = vmatpush.msra.mxu3 %v287_v57  ;;  %v189_v0 = vld [vmem:[#allocation5] sm:$0xff]  ;;  %v268_v30 = vld [vmem:[#allocation5 + $0x278] sm:$0xff] }
  0x47   :  { %v223_v59 = vld [vmem:[#allocation5 + $0x110] sm:$0xff]  ;;  %331 = vmatpush.msra.mxu0 %v191_v58  ;;  %v221_v1 = vld [vmem:[#allocation5 + $0x100] sm:$0xff]  ;;  %378 = vmatpush.msra.mxu2 %v253_v60  ;;  %v302_v31 = vld [vmem:[#allocation5 + $0x388] sm:$0xff] }
  0x48   :  { %354 = vmatpush.msra.mxu1 %v223_v59  ;;  %401 = vmatpush.msra.mxu3 %v285_v61  ;;  %v1440_v28 = vld [vmem:[#allocation2 + $0x10] sm:$0xff]  ;;  %v1442_v32 = vld [vmem:[#allocation2 + $0x18] sm:$0xff]  ;;  %v206_v33 = vld [vmem:[#allocation5 + $0x88] sm:$0xff] }
  0x49   :  { %455 = vmatpush.msrb.mxu2 %v284_v62  ;;  %332 = vmatpush.msra.mxu0 %v189_v0  ;;  %v238_v34 = vld [vmem:[#allocation5 + $0x188] sm:$0xff]  ;;  %v300_v36 = vld [vmem:[#allocation5 + $0x378] sm:$0xff]  ;;  %v1445_v37 = vld [vmem:[#allocation2] sm:$0xff] }
  0x4a   :  { %478 = vmatpush.msrb.mxu3 %v316_v63  ;;  %355 = vmatpush.msra.mxu1 %v221_v1  ;;  %v266_v35 = vld [vmem:[#allocation5 + $0x268] sm:$0xff]  ;;  %v204_v39 = vld [vmem:[#allocation5 + $0x78] sm:$0xff]  ;;  %v187_v47 = vld [vmem:[#allocation2 + $0x30] sm:$0xff] }
  0x4b   :  { %456 = vmatpush.msrb.mxu2 %v282_v2  ;;  %409 = vmatpush.msrb.mxu0 %v220_v3  ;;  %v1448_v38 = vld [vmem:[#allocation2 + $0x8] sm:$0xff]  ;;  %v236_v40 = vld [vmem:[#allocation5 + $0x178] sm:$0xff]  ;;  %v185_v57 = vld [vmem:[#allocation2 + $0x20] sm:$0xff] }
  0x4c   :  { %432 = vmatpush.msrb.mxu1 %v252_v4  ;;  %479 = vmatpush.msrb.mxu3 %v314_v5  ;;  %v264_v41 = vld [vmem:[#allocation5 + $0x258] sm:$0xff]  ;;  %v298_v42 = vld [vmem:[#allocation5 + $0x368] sm:$0xff] }
  0x4d   :  { %457 = vmatpush.msrb.mxu2 %v280_v6  ;;  %410 = vmatpush.msrb.mxu0 %v218_v7  ;;  %v202_v43 = vld [vmem:[#allocation5 + $0x68] sm:$0xff]  ;;  %v296_v46 = vld [vmem:[#allocation5 + $0x358] sm:$0xff] }
  0x4e   :  { %433 = vmatpush.msrb.mxu1 %v250_v8  ;;  %480 = vmatpush.msrb.mxu3 %v312_v9  ;;  %v234_v44 = vld [vmem:[#allocation5 + $0x168] sm:$0xff]  ;;  %v200_v48 = vld [vmem:[#allocation5 + $0x58] sm:$0xff] }
  0x4f   :  { %458 = vmatpush.msrb.mxu2 %v278_v10  ;;  %411 = vmatpush.msrb.mxu0 %v216_v11  ;;  %v262_v45 = vld [vmem:[#allocation5 + $0x248] sm:$0xff]  ;;  %v232_v49 = vld [vmem:[#allocation5 + $0x158] sm:$0xff] }
  0x50   :  { %434 = vmatpush.msrb.mxu1 %v248_v12  ;;  %481 = vmatpush.msrb.mxu3 %v310_v13  ;;  %v260_v50 = vld [vmem:[#allocation5 + $0x238] sm:$0xff]  ;;  %v294_v51 = vld [vmem:[#allocation5 + $0x348] sm:$0xff]  ;;  %v554_v13 = vld [vmem:[#allocation7 + $0xf0] sm:$0xff] }
  0x51   :  { %459 = vmatpush.msrb.mxu2 %v276_v14  ;;  %412 = vmatpush.msrb.mxu0 %v214_v15  ;;  %v188_v52 = vld [vmem:[#allocation2 + $0x38] sm:$0xff]  ;;  %v198_v53 = vld [vmem:[#allocation5 + $0x48] sm:$0xff]  ;;  %v538_v14 = vld [vmem:[#allocation7 + $0x70] sm:$0xff] }
  0x52   :  { %435 = vmatpush.msrb.mxu1 %v246_v16  ;;  %482 = vmatpush.msrb.mxu3 %v308_v17  ;;  %v230_v54 = vld [vmem:[#allocation5 + $0x148] sm:$0xff]  ;;  %v292_v56 = vld [vmem:[#allocation5 + $0x338] sm:$0xff] }
  0x53   :  { %460 = vmatpush.msrb.mxu2 %v274_v18  ;;  %413 = vmatpush.msrb.mxu0 %v212_v19  ;;  %v258_v55 = vld [vmem:[#allocation5 + $0x228] sm:$0xff]  ;;  %v196_v59 = vld [vmem:[#allocation5 + $0x38] sm:$0xff] }
  0x54   :  { %436 = vmatpush.msrb.mxu1 %v244_v20  ;;  %483 = vmatpush.msrb.mxu3 %v306_v21  ;;  %v186_v58 = vld [vmem:[#allocation2 + $0x28] sm:$0xff]  ;;  %v228_v60 = vld [vmem:[#allocation5 + $0x138] sm:$0xff]  ;;  %v552_v20 = vld [vmem:[#allocation7 + $0xe0] sm:$0xff] }
  0x55   :  { %461 = vmatpush.msrb.mxu2 %v272_v22  ;;  %414 = vmatpush.msrb.mxu0 %v210_v23  ;;  %v256_v61 = vld [vmem:[#allocation5 + $0x218] sm:$0xff]  ;;  %v290_v62 = vld [vmem:[#allocation5 + $0x328] sm:$0xff]  ;;  %v536_v21 = vld [vmem:[#allocation7 + $0x60] sm:$0xff] }
  0x56   :  { %437 = vmatpush.msrb.mxu1 %v242_v24  ;;  %484 = vmatpush.msrb.mxu3 %v304_v25  ;;  %v194_v63 = vld [vmem:[#allocation5 + $0x28] sm:$0xff]  ;;  %v288_v2 = vld [vmem:[#allocation5 + $0x318] sm:$0xff]  ;;  %v550_v25 = vld [vmem:[#allocation7 + $0xd0] sm:$0xff] }
  0x57   :  { %462 = vmatpush.msrb.mxu2 %v270_v26  ;;  %415 = vmatpush.msrb.mxu0 %v208_v27  ;;  %v226_v0 = vld [vmem:[#allocation5 + $0x128] sm:$0xff]  ;;  %v192_v3 = vld [vmem:[#allocation5 + $0x18] sm:$0xff] }
  0x58   :  { %379 = vmatmul.f32.vlgmr.msra.gmra.mxu2 %v1440_v28  ;;  %438 = vmatpush.msrb.mxu1 %v240_v29  ;;  %v254_v1 = vld [vmem:[#allocation5 + $0x208] sm:$0xff]  ;;  %v224_v4 = vld [vmem:[#allocation5 + $0x118] sm:$0xff] }
  0x59   :  { %463 = vmatpush.msrb.mxu2 %v268_v30  ;;  %485 = vmatpush.msrb.mxu3 %v302_v31  ;;  %v286_v5 = vld [vmem:[#allocation5 + $0x308] sm:$0xff]  ;;  %v539_v12 = vld [vmem:[#allocation7 + $0x78] sm:$0xff] }
  0x5a   :  { %402 = vmatmul.f32.vlgmr.msra.gmra.mxu3 %v1442_v32  ;;  %416 = vmatpush.msrb.mxu0 %v206_v33  ;;  %v190_v6 = vld [vmem:[#allocation5 + $0x8] sm:$0xff]  ;;  %v551_v22 = vld [vmem:[#allocation7 + $0xd8] sm:$0xff] }
  0x5b   :  { %439 = vmatpush.msrb.mxu1 %v238_v34  ;;  %464 = vmatpush.msrb.mxu2 %v266_v35  ;;  %v222_v7 = vld [vmem:[#allocation5 + $0x108] sm:$0xff]  ;;  %v535_v23 = vld [vmem:[#allocation7 + $0x58] sm:$0xff] }
  0x5c   :  { %486 = vmatpush.msrb.mxu3 %v300_v36  ;;  %333 = vmatmul.f32.vlgmr.msra.gmra.mxu0 %v1445_v37  ;;  %v553_v17 = vld [vmem:[#allocation7 + $0xe8] sm:$0xff] }
  0x5d   :  { %356 = vmatmul.f32.vlgmr.msra.gmra.mxu1 %v1448_v38  ;;  %417 = vmatpush.msrb.mxu0 %v204_v39  ;;  %v537_v18 = vld [vmem:[#allocation7 + $0x68] sm:$0xff] }
  0x5e   :  { %440 = vmatpush.msrb.mxu1 %v236_v40  ;;  %465 = vmatpush.msrb.mxu2 %v264_v41  ;;  %v549_v30 = vld [vmem:[#allocation7 + $0xc8] sm:$0xff] }
  0x5f   :  { %487 = vmatpush.msrb.mxu3 %v298_v42  ;;  %418 = vmatpush.msrb.mxu0 %v202_v43 }
  0x60   :  { %441 = vmatpush.msrb.mxu1 %v234_v44  ;;  %466 = vmatpush.msrb.mxu2 %v262_v45 }
  0x61   :  { %488 = vmatpush.msrb.mxu3 %v296_v46  ;;  %382 = vmatmul.f32.gmra.mxu2 %v187_v47 }
  0x62   :  { %419 = vmatpush.msrb.mxu0 %v200_v48  ;;  %442 = vmatpush.msrb.mxu1 %v232_v49  ;;  %v533_v48 = vld [vmem:[#allocation7 + $0x48] sm:$0xff]  ;;  %v548_v49 = vld [vmem:[#allocation7 + $0xc0] sm:$0xff] }
  0x63   :  { %467 = vmatpush.msrb.mxu2 %v260_v50  ;;  %489 = vmatpush.msrb.mxu3 %v294_v51  ;;  %v532_v50 = vld [vmem:[#allocation7 + $0x40] sm:$0xff]  ;;  %v547_v51 = vld [vmem:[#allocation7 + $0xb8] sm:$0xff] }
  0x64   :  { %405 = vmatmul.f32.gmra.mxu3 %v188_v52  ;;  %420 = vmatpush.msrb.mxu0 %v198_v53  ;;  %v546_v53 = vld [vmem:[#allocation7 + $0xb0] sm:$0xff] }
  0x65   :  { %443 = vmatpush.msrb.mxu1 %v230_v54  ;;  %468 = vmatpush.msrb.mxu2 %v258_v55  ;;  %v530_v54 = vld [vmem:[#allocation7 + $0x30] sm:$0xff]  ;;  %v545_v55 = vld [vmem:[#allocation7 + $0xa8] sm:$0xff] }
  0x66   :  { %490 = vmatpush.msrb.mxu3 %v292_v56  ;;  %336 = vmatmul.f32.gmra.mxu0 %v185_v57  ;;  %v529_v56 = vld [vmem:[#allocation7 + $0x28] sm:$0xff] }
  0x67   :  { %359 = vmatmul.f32.gmra.mxu1 %v186_v58  ;;  %421 = vmatpush.msrb.mxu0 %v196_v59  ;;  %v543_v59 = vld [vmem:[#allocation7 + $0x98] sm:$0xff] }
  0x68   :  { %444 = vmatpush.msrb.mxu1 %v228_v60  ;;  %469 = vmatpush.msrb.mxu2 %v256_v61  ;;  %v527_v60 = vld [vmem:[#allocation7 + $0x18] sm:$0xff]  ;;  %v542_v61 = vld [vmem:[#allocation7 + $0x90] sm:$0xff] }
  0x69   :  { %491 = vmatpush.msrb.mxu3 %v290_v62  ;;  %422 = vmatpush.msrb.mxu0 %v194_v63  ;;  %v526_v62 = vld [vmem:[#allocation7 + $0x10] sm:$0xff]  ;;  %v541_v63 = vld [vmem:[#allocation7 + $0x88] sm:$0xff] }
  0x6a   :  { %445 = vmatpush.msrb.mxu1 %v226_v0  ;;  %470 = vmatpush.msrb.mxu2 %v254_v1  ;;  %v525_v0 = vld [vmem:[#allocation7 + $0x8] sm:$0xff]  ;;  %v540_v1 = vld [vmem:[#allocation7 + $0x80] sm:$0xff] }
  0x6b   :  { %492 = vmatpush.msrb.mxu3 %v288_v2  ;;  %471 = vmatmul.f32.vlgmr.msrb.gmra.mxu2 %v1440_v28  ;;  %v534_v28 = vld [vmem:[#allocation7 + $0x50] sm:$0xff]  ;;  %v524_v2 = vld [vmem:[#allocation7] sm:$0xff] }
  0x6c   :  { %423 = vmatpush.msrb.mxu0 %v192_v3  ;;  %446 = vmatpush.msrb.mxu1 %v224_v4 }
  0x6d   :  { %493 = vmatpush.msrb.mxu3 %v286_v5 }
  0x6e   :  { %494 = vmatmul.f32.vlgmr.msrb.gmra.mxu3 %v1442_v32  ;;  %424 = vmatpush.msrb.mxu0 %v190_v6 }
  0x6f   :  { %447 = vmatpush.msrb.mxu1 %v222_v7  ;;  %425 = vmatmul.f32.vlgmr.msrb.gmra.mxu0 %v1445_v37 }
  0x70   :  { %448 = vmatmul.f32.vlgmr.msrb.gmra.mxu1 %v1448_v38  ;;  %561 = vmatpush.msra.mxu0 %v539_v12 }
  0x71   :  { %585 = vmatpush.msra.mxu1 %v554_v13 }
  0x72   :  { %562 = vmatpush.msra.mxu0 %v538_v14 }
  0x73   :  { %474 = vmatmul.f32.gmra.mxu2 %v187_v47  ;;  %586 = vmatpush.msra.mxu1 %v553_v17 }
  0x74   :  { %563 = vmatpush.msra.mxu0 %v537_v18 }
  0x75   :  { %587 = vmatpush.msra.mxu1 %v552_v20  ;;  %v607_v20 = vld [vmem:[#allocation8] sm:$0xff] }
  0x76   :  { %497 = vmatmul.f32.gmra.mxu3 %v188_v52  ;;  %564 = vmatpush.msra.mxu0 %v536_v21  ;;  %v531_v52 = vld [vmem:[#allocation7 + $0x38] sm:$0xff]  ;;  %v1468_v21 = vld [vmem:[#allocation16 + $0x78] sm:$0xff] }
  0x77   :  { %428 = vmatmul.f32.gmra.mxu0 %v185_v57  ;;  %588 = vmatpush.msra.mxu1 %v551_v22  ;;  %v544_v57 = vld [vmem:[#allocation7 + $0xa0] sm:$0xff]  ;;  %v1470_v22 = vld [vmem:[#allocation16 + $0x70] sm:$0xff] }
  0x78   :  { %451 = vmatmul.f32.gmra.mxu1 %v186_v58  ;;  %565 = vmatpush.msra.mxu0 %v535_v23  ;;  %v528_v58 = vld [vmem:[#allocation7 + $0x20] sm:$0xff] }
  0x79   :  { %589 = vmatpush.msra.mxu1 %v550_v25  ;;  %v1474_v23 = vld [vmem:[#allocation16 + $0x68] sm:$0xff]  ;;  %v1482_v25 = vld [vmem:[#allocation16 + $0x58] sm:$0xff] }
  0x7a   :  { %566 = vmatpush.msra.mxu0 %v534_v28  ;;  %v1494_v28 = vld [vmem:[#allocation16 + $0x40] sm:$0xff] }
  0x7b   :  { %590 = vmatpush.msra.mxu1 %v549_v30  ;;  %v1504_v30 = vld [vmem:[#allocation16 + $0x30] sm:$0xff] }
  0x7c   :  { %567 = vmatpush.msra.mxu0 %v533_v48 }
  0x7d   :  { %591 = vmatpush.msra.mxu1 %v548_v49 }
  0x7e   :  { %568 = vmatpush.msra.mxu0 %v532_v50 }
  0x7f   :  { %592 = vmatpush.msra.mxu1 %v547_v51 }
  0x80   :  { %569 = vmatpush.msra.mxu0 %v531_v52 }
  0x81   :  { %593 = vmatpush.msra.mxu1 %v546_v53 }
  0x82   :  { %570 = vmatpush.msra.mxu0 %v530_v54 }
  0x83   :  { %594 = vmatpush.msra.mxu1 %v545_v55 }
  0x84   :  { %571 = vmatpush.msra.mxu0 %v529_v56 }
  0x85   :  { %595 = vmatpush.msra.mxu1 %v544_v57 }
  0x86   :  { %572 = vmatpush.msra.mxu0 %v528_v58 }
  0x87   :  { %596 = vmatpush.msra.mxu1 %v543_v59 }
  0x88   :  { %573 = vmatpush.msra.mxu0 %v527_v60 }
  0x89   :  { %597 = vmatpush.msra.mxu1 %v542_v61 }
  0x8a   :  { %574 = vmatpush.msra.mxu0 %v526_v62 }
  0x8b   :  { %598 = vmatpush.msra.mxu1 %v541_v63 }
  0x8c   :  { %575 = vmatpush.msra.mxu0 %v525_v0 }
  0x8d   :  { %599 = vmatpush.msra.mxu1 %v540_v1 }
  0x8e   :  { %576 = vmatpush.msra.mxu0 %v524_v2 }
  0xd9   :  { %v334_v8 = vpop.f32.mrf.mxu0 }
  0xda   :  { %v357_v9 = vpop.f32.mrf.mxu1 }
  0xdb   :  { %v358_v10 = vadd.f32 %v357_v9, %v334_v8  ;;  %v380_v11 = vpop.f32.mrf.mxu2 }
  0xdd   :  { %v381_v15 = vadd.f32 %v380_v11, %v358_v10  ;;  %v403_v16 = vpop.f32.mrf.mxu3 }
  0xdf   :  { %v1456_v19 = vadd.f32 %v403_v16, %v381_v15 }
  0xe1   :  { %505 = vrot.lane.b32.xlu0 %v1456_v19, %s1352_s6 }
  0xe3   :  { %v337_v24 = vpop.f32.mrf.mxu0 }
  0xe4   :  { %v360_v26 = vpop.f32.mrf.mxu1  ;;  %v383_v27 = vpop.f32.mrf.mxu2 }
  0xe5   :  { %v361_v29 = vadd.f32 %v360_v26, %v337_v24  ;;  %v1478_v24 = vld [vmem:[#allocation16 + $0x60] sm:$0xff]  ;;  %v1486_v26 = vld [vmem:[#allocation16 + $0x50] sm:$0xff] }
  0xe7   :  { %v384_v31 = vadd.f32 %v383_v27, %v361_v29  ;;  %v406_v32 = vpop.f32.mrf.mxu3  ;;  %v1490_v27 = vld [vmem:[#allocation16 + $0x48] sm:$0xff]  ;;  %v1500_v29 = vld [vmem:[#allocation16 + $0x38] sm:$0xff] }
  0xe9   :  { %v1460_v33 = vadd.f32 %v406_v32, %v384_v31  ;;  %v1508_v31 = vld [vmem:[#allocation16 + $0x28] sm:$0xff]  ;;  %v1512_v32 = vld [vmem:[#allocation16 + $0x20] sm:$0xff] }
  0xeb   :  { %509 = vrot.lane.b32.xlu1 %v1460_v33, %s1352_s6 }
  0xec   :  { %v426_v34 = vpop.f32.mrf.mxu0 }
  0xed   :  { %v449_v35 = vpop.f32.mrf.mxu1 }
  0xee   :  { %v450_v36 = vadd.f32 %v449_v35, %v426_v34  ;;  %v472_v37 = vpop.f32.mrf.mxu2  ;;  %v1520_v34 = vld [vmem:[#allocation16 + $0x10] sm:$0xff]  ;;  %v1524_v35 = vld [vmem:[#allocation16 + $0x8] sm:$0xff] }
  0xf0   :  { %v473_v38 = vadd.f32 %v472_v37, %v450_v36  ;;  %v1526_v36 = vld [vmem:[#allocation16] sm:$0xff] }
  0xf1   :  { %v495_v39 = vpop.f32.mrf.mxu3 }
  0xf2   :  { %v496_v40 = vadd.f32 %v495_v39, %v473_v38 }
  0xf4   :  { %507 = vrot.lane.b32.xlu0 %v496_v40, %s1352_s6  ;;  %v429_v41 = vpop.f32.mrf.mxu0 }
  0xf5   :  { %v452_v42 = vpop.f32.mrf.mxu1 }
  0xf6   :  { %v453_v43 = vadd.f32 %v452_v42, %v429_v41  ;;  %v475_v44 = vpop.f32.mrf.mxu2 }
  0xf8   :  { %v476_v45 = vadd.f32 %v475_v44, %v453_v43 }
  0xf9   :  { %v498_v46 = vpop.f32.mrf.mxu3 }
  0xfa   :  { %v499_v47 = vadd.f32 %v498_v46, %v476_v45 }
  0xfc   :  { %511 = vrot.lane.b32.xlu1 %v499_v47, %s1352_s6 }
 0x153   :  { %v506_v3 = vpop.permute.xlu0 %505 }
 0x15d   :  { %v510_v4 = vpop.permute.xlu1 %509 }
 0x166   :  { %v508_v5 = vpop.permute.xlu0 %507 }
 0x167   :  { %v514_v6 = vsel %vm513_vm0, %v506_v3, %v508_v5  ;;  %v521_v7 = vmax.f32 %v496_v40, %v508_v5 }
 0x168   :  { %v520_v8 = vmax.f32 %v1456_v19, %v514_v6  ;;  %v632_v19 = vld [vmem:[#allocation10] sm:$0xff] }
 0x169   :  { %1050 = vmatmul.msk.f32.vlgmr.msra.gmra.mxu1 %vm513_vm0, %v521_v7 }
 0x16a   :  { %577 = vmatmul.f32.vlgmr.msra.gmra.mxu0 %v520_v8 }
 0x16e   :  { %v512_v9 = vpop.permute.xlu1 %511 }
 0x16f   :  { %v515_v10 = vsel %vm513_vm0, %v510_v4, %v512_v9  ;;  %v523_v11 = vmax.f32 %v499_v47, %v512_v9 }
 0x170   :  { %v522_v12 = vmax.f32 %v1460_v33, %v515_v10  ;;  %v1516_v33 = vld [vmem:[#allocation16 + $0x18] sm:$0xff] }
 0x171   :  { %1051 = vmatmul.msk.f32.gmra.mxu1 %vm513_vm0, %v523_v11 }
 0x172   :  { %580 = vmatmul.f32.gmra.mxu0 %v522_v12 }
 0x1e6   :  { %v601_v13 = vpop.f32.mrf.mxu1 }
 0x1e7   :  { %v578_v14 = vpop.f32.mrf.mxu0 }
 0x1e8   :  { %v602_v18 = vadd.f32 %v601_v13, %v578_v14 }
 0x1ee   :  { %v604_v15 = vpop.f32.mrf.mxu1 }
 0x1ef   :  { %v581_v16 = vpop.f32.mrf.mxu0 }
 0x1f0   :  { %v605_v17 = vadd.f32 %v604_v15, %v581_v16 }
 0x1f2   :  { %626 = vmatpush.msra.mxu2 %v605_v17  ;;  %650 = vmatpush.msra.mxu3 %v605_v17 }
 0x1f4   :  { %627 = vmatpush.msra.mxu2 %v602_v18  ;;  %651 = vmatpush.msra.mxu3 %v602_v18 }
 0x1f5   :  { %1052 = vmatmul.msk.f32.vlgmr.msra.gmra.mxu2 %vm608_vm1, %v607_v20  ;;  %1053 = vmatmul.msk.f32.vlgmr.msra.gmra.mxu3 %vm608_vm1, %v632_v19 }
 0x1f6   :  { %663 = vmatpush.msrb.mxu2 %v1468_v21  ;;  %692 = vmatpush.msrb.mxu3 %v1468_v21 }
 0x1f8   :  { %664 = vmatpush.msrb.mxu2 %v1470_v22  ;;  %693 = vmatpush.msrb.mxu3 %v1470_v22 }
 0x1fa   :  { %665 = vmatpush.msrb.mxu2 %v1474_v23  ;;  %694 = vmatpush.msrb.mxu3 %v1474_v23 }
 0x1fc   :  { %666 = vmatpush.msrb.mxu2 %v1478_v24  ;;  %695 = vmatpush.msrb.mxu3 %v1478_v24 }
 0x1fe   :  { %667 = vmatpush.msrb.mxu2 %v1482_v25  ;;  %696 = vmatpush.msrb.mxu3 %v1482_v25 }
 0x200   :  { %668 = vmatpush.msrb.mxu2 %v1486_v26  ;;  %697 = vmatpush.msrb.mxu3 %v1486_v26 }
 0x202   :  { %669 = vmatpush.msrb.mxu2 %v1490_v27  ;;  %698 = vmatpush.msrb.mxu3 %v1490_v27 }
 0x204   :  { %670 = vmatpush.msrb.mxu2 %v1494_v28  ;;  %699 = vmatpush.msrb.mxu3 %v1494_v28 }
 0x206   :  { %671 = vmatpush.msrb.mxu2 %v1500_v29  ;;  %700 = vmatpush.msrb.mxu3 %v1500_v29 }
 0x208   :  { %672 = vmatpush.msrb.mxu2 %v1504_v30  ;;  %701 = vmatpush.msrb.mxu3 %v1504_v30 }
 0x20a   :  { %673 = vmatpush.msrb.mxu2 %v1508_v31  ;;  %702 = vmatpush.msrb.mxu3 %v1508_v31 }
 0x20c   :  { %674 = vmatpush.msrb.mxu2 %v1512_v32  ;;  %703 = vmatpush.msrb.mxu3 %v1512_v32 }
 0x20e   :  { %675 = vmatpush.msrb.mxu2 %v1516_v33  ;;  %704 = vmatpush.msrb.mxu3 %v1516_v33 }
 0x210   :  { %676 = vmatpush.msrb.mxu2 %v1520_v34  ;;  %705 = vmatpush.msrb.mxu3 %v1520_v34 }
 0x212   :  { %677 = vmatpush.msrb.mxu2 %v1524_v35  ;;  %706 = vmatpush.msrb.mxu3 %v1524_v35 }
 0x214   :  { %678 = vmatpush.msrb.mxu2 %v1526_v36  ;;  %707 = vmatpush.msrb.mxu3 %v1526_v36 }
 0x216   :  { %927 = vmatpush.msra.mxu3 %v1468_v21 }
 0x218   :  { %928 = vmatpush.msra.mxu3 %v1470_v22 }
 0x21a   :  { %929 = vmatpush.msra.mxu3 %v1474_v23 }
 0x21c   :  { %930 = vmatpush.msra.mxu3 %v1478_v24 }
 0x21e   :  { %931 = vmatpush.msra.mxu3 %v1482_v25 }
 0x220   :  { %932 = vmatpush.msra.mxu3 %v1486_v26 }
 0x222   :  { %933 = vmatpush.msra.mxu3 %v1490_v27 }
 0x224   :  { %934 = vmatpush.msra.mxu3 %v1494_v28 }
 0x226   :  { %935 = vmatpush.msra.mxu3 %v1500_v29 }
 0x228   :  { %936 = vmatpush.msra.mxu3 %v1504_v30 }
 0x22a   :  { %937 = vmatpush.msra.mxu3 %v1508_v31 }
 0x22c   :  { %938 = vmatpush.msra.mxu3 %v1512_v32 }
 0x22e   :  { %939 = vmatpush.msra.mxu3 %v1516_v33 }
 0x230   :  { %940 = vmatpush.msra.mxu3 %v1520_v34 }
 0x232   :  { %941 = vmatpush.msra.mxu3 %v1524_v35 }
 0x234   :  { %942 = vmatpush.msra.mxu3 %v1526_v36 }
 0x278   :  { %v629_v37 = vpop.f32.mrf.mxu2  ;;  %v653_v38 = vpop.f32.mrf.mxu3 }
 0x279   :  { %v656_v39 = vmax.f32 %v629_v37, %v653_v38 }
 0x27b   :  { %v657_v40 = vrot.slane %v656_v39, 4 }
 0x27d   :  { %v658_v41 = vadd.f32 %v657_v40, %v656_v39 }
 0x27f   :  { %v659_v42 = vrot.slane %v658_v41, 2 }
 0x281   :  { %v660_v43 = vadd.f32 %v659_v42, %v658_v41 }
 0x283   :  { %v661_v44 = vrot.slane %v660_v43, 1 }
 0x285   :  { %v662_v45 = vadd.f32 %v661_v44, %v660_v43 }
 0x287   :  { %679 = vmatmul.f32.vlgmr.msrb.gmra.mxu2 %v662_v45 }
 0x30a   :  { %v680_v46 = vpop.f32.mrf.mxu2 }
 0x30b   :  { %v683_v47 = vperm.slane %v680_v46, 0 }
 0x30d   :  { %v684_v48 = vsub.f32 %v656_v39, %v683_v47 }
 0x30f   :  { %v685_v49 = vmul.f32 %v684_v48, %v684_v48 }
 0x311   :  { %v686_v50 = vrot.slane %v685_v49, 4 }
 0x313   :  { %v687_v51 = vadd.f32 %v686_v50, %v685_v49 }
 0x315   :  { %v688_v52 = vrot.slane %v687_v51, 2 }
 0x317   :  { %v689_v53 = vadd.f32 %v688_v52, %v687_v51 }
 0x319   :  { %v690_v54 = vrot.slane %v689_v53, 1 }
 0x31b   :  { %v691_v55 = vadd.f32 %v690_v54, %v689_v53  ;;  %v764_v53 = vld [vmem:[#allocation11] sm:$0xff]  ;;  %v844_v54 = vld [vmem:[#allocation14 + $0xf8] sm:$0xff] }
 0x31d   :  { %708 = vmatmul.f32.vlgmr.msrb.gmra.mxu3 %v691_v55  ;;  %v843_v55 = vld [vmem:[#allocation14 + $0xf0] sm:$0xff] }
 0x3a0   :  { %v709_v56 = vpop.f32.mrf.mxu3 }
 0x3a1   :  { %v710_v57 = vadd.f32 1e-12, %v709_v56  ;;  %v828_v56 = vld [vmem:[#allocation14 + $0x78] sm:$0xff] }
 0x3a2   :  { %861 = vmatpush.msrb.mxu1 %v828_v56 }
 0x3a3   :  { %1073 = vrsqrt.f32 %v710_v57  ;;  %vm718_vm3 = vweird.f32 %v710_v57 }
 0x3a9   :  { %v1074_v58 = vpop.eup %1073 }
 0x3aa   :  { %v713_v59 = vmul.f32 %v1074_v58, %v710_v57  ;;  %vm719_vm2 = vweird.f32 %v1074_v58  ;;  %v827_v57 = vld [vmem:[#allocation14 + $0x70] sm:$0xff] }
 0x3ab   :  { %vm720_vm4 = vmor %vm718_vm3, %vm719_vm2  ;;  %862 = vmatpush.msrb.mxu1 %v827_v57 }
 0x3ac   :  { %v714_v60 = vmul.f32 %v1074_v58, %v713_v59  ;;  %v842_v59 = vld [vmem:[#allocation14 + $0xe8] sm:$0xff] }
 0x3ae   :  { %v715_v61 = vmul.f32 0.5, %v714_v60  ;;  %v826_v60 = vld [vmem:[#allocation14 + $0x68] sm:$0xff] }
 0x3af   :  { %863 = vmatpush.msrb.mxu1 %v826_v60 }
 0x3b0   :  { %v716_v62 = vsub.f32 1.5, %v715_v61  ;;  %v859_v61 = vld [vmem:[#allocation14 + $0x170] sm:$0xff] }
 0x3b2   :  { %v717_v63 = vmul.f32 %v1074_v58, %v716_v62  ;;  %v858_v62 = vld [vmem:[#allocation14 + $0x168] sm:$0xff] }
 0x3b4   :  { %v721_v0 = vsel %vm720_vm4, %v1074_v58, %v717_v63  ;;  %v860_v58 = vld [vmem:[#allocation14 + $0x178] sm:$0xff]  ;;  %v841_v63 = vld [vmem:[#allocation14 + $0xe0] sm:$0xff] }
 0x3b5   :  { %v722_v1 = vperm.slane %v721_v0, 0  ;;  %901 = vmatpush.msra.mxu2 %v860_v58  ;;  %v825_v0 = vld [vmem:[#allocation14 + $0x60] sm:$0xff] }
 0x3b6   :  { %864 = vmatpush.msrb.mxu1 %v825_v0 }
 0x3b7   :  { %v723_v2 = vmul.f32 %v722_v1, %v684_v48  ;;  %902 = vmatpush.msra.mxu2 %v859_v61  ;;  %v789_v1 = vld [vmem:[#allocation13] sm:$0xff] }
 0x3b9   :  { %v725_v3 = vmul.f32 0.70710677, %v723_v2  ;;  %v724_v50 = vmul.f32 0.5, %v723_v2  ;;  %v857_v2 = vld [vmem:[#allocation14 + $0x160] sm:$0xff]  ;;  %903 = vmatpush.msra.mxu2 %v858_v62 }
 0x3bb   :  { %v726_v4 = vand.u32 2147483647, %v725_v3  ;;  %vm759_vm9 = vcmp.ge.f32.partialorder %v725_v3, 0.0  ;;  %v840_v3 = vld [vmem:[#allocation14 + $0xd8] sm:$0xff]  ;;  %904 = vmatpush.msra.mxu2 %v857_v2 }
 0x3bd   :  { %v727_v5 = vmul.f32 0.3275911, %v726_v4  ;;  %v753_v16 = vsub.f32 0.0, %v726_v4 }
 0x3bf   :  { %v728_v6 = vadd.f32 1.0, %v727_v5  ;;  %v754_v19 = vmul.f32 %v753_v16, %v726_v4  ;;  %v824_v4 = vld [vmem:[#allocation14 + $0x58] sm:$0xff] }
 0x3c0   :  { %v856_v5 = vld [vmem:[#allocation14 + $0x158] sm:$0xff]  ;;  %865 = vmatpush.msrb.mxu1 %v824_v4 }
 0x3c1   :  { %1075 = vrcp.f32 %v728_v6  ;;  %v740_v10 = vand.u32 2147483648, %v728_v6  ;;  %v738_v12 = vand.u32 2147483647, %v728_v6  ;;  %vm734_vm6 = vweird.f32 %v728_v6  ;;  %905 = vmatpush.msra.mxu2 %v856_v5  ;;  %v820_v16 = vld [vmem:[#allocation14 + $0x38] sm:$0xff] }
 0x3c2   :  { %v755_v39 = vmul.f32 1.442695, %v754_v19  ;;  %v851_v19 = vld [vmem:[#allocation14 + $0x130] sm:$0xff] }
 0x3c3   :  { %v741_v14 = vor.u32 1.1754944e-38, %v740_v10  ;;  %vm739_vm8 = vcmp.eq.f32.partialorder %v738_v12, 8.507059e+37  ;;  %v822_v10 = vld [vmem:[#allocation14 + $0x48] sm:$0xff]  ;;  %v837_v12 = vld [vmem:[#allocation14 + $0xc0] sm:$0xff] }
 0x3c4   :  { %1077 = vpow2.f32 %v755_v39  ;;  %v850_v39 = vld [vmem:[#allocation14 + $0x128] sm:$0xff] }
 0x3c7   :  { %v1076_v7 = vpop.eup %1075 }
 0x3c8   :  { %v730_v8 = vmul.f32 %v1076_v7, %v728_v6  ;;  %vm735_vm5 = vweird.f32 %v1076_v7  ;;  %v839_v6 = vld [vmem:[#allocation14 + $0xd0] sm:$0xff] }
 0x3c9   :  { %vm736_vm7 = vmor %vm734_vm6, %vm735_vm5 }
 0x3ca   :  { %v731_v9 = vsub.f32 1.0, %v730_v8  ;;  %v1078_v45 = vpop.eup %1077  ;;  %v855_v8 = vld [vmem:[#allocation14 + $0x150] sm:$0xff] }
 0x3cb   :  { %906 = vmatpush.msra.mxu2 %v855_v8 }
 0x3cc   :  { %v732_v11 = vmul.f32 %v1076_v7, %v731_v9  ;;  %v838_v9 = vld [vmem:[#allocation14 + $0xc8] sm:$0xff] }
 0x3ce   :  { %v733_v13 = vadd.f32 %v1076_v7, %v732_v11  ;;  %v854_v11 = vld [vmem:[#allocation14 + $0x148] sm:$0xff] }
 0x3cf   :  { %907 = vmatpush.msra.mxu2 %v854_v11 }
 0x3d0   :  { %v737_v15 = vsel %vm736_vm7, %v1076_v7, %v733_v13  ;;  %v823_v7 = vld [vmem:[#allocation14 + $0x50] sm:$0xff]  ;;  %v821_v13 = vld [vmem:[#allocation14 + $0x40] sm:$0xff] }
 0x3d1   :  { %v742_v17 = vsel %vm739_vm8, %v741_v14, %v737_v15  ;;  %866 = vmatpush.msrb.mxu1 %v823_v7  ;;  %v853_v14 = vld [vmem:[#allocation14 + $0x140] sm:$0xff]  ;;  %v836_v15 = vld [vmem:[#allocation14 + $0xb8] sm:$0xff] }
 0x3d2   :  { %v744_v18 = vmul.f32 1.0614054, %v742_v17  ;;  %908 = vmatpush.msra.mxu2 %v853_v14 }
 0x3d3   :  { %867 = vmatpush.msrb.mxu1 %v822_v10 }
 0x3d4   :  { %v745_v20 = vadd.f32 -1.4531521, %v744_v18  ;;  %v835_v18 = vld [vmem:[#allocation14 + $0xb0] sm:$0xff] }
 0x3d5   :  { %868 = vmatpush.msrb.mxu1 %v821_v13 }
 0x3d6   :  { %v746_v37 = vmul.f32 %v745_v20, %v742_v17  ;;  %v819_v20 = vld [vmem:[#allocation14 + $0x30] sm:$0xff] }
 0x3d7   :  { %869 = vmatpush.msrb.mxu1 %v820_v16 }
 0x3d8   :  { %v747_v38 = vadd.f32 1.4214138, %v746_v37  ;;  %v834_v37 = vld [vmem:[#allocation14 + $0xa8] sm:$0xff] }
 0x3d9   :  { %870 = vmatpush.msrb.mxu1 %v819_v20 }
 0x3da   :  { %v748_v40 = vmul.f32 %v747_v38, %v742_v17  ;;  %v818_v38 = vld [vmem:[#allocation14 + $0x28] sm:$0xff] }
 0x3db   :  { %871 = vmatpush.msrb.mxu1 %v818_v38 }
 0x3dc   :  { %v749_v41 = vadd.f32 -0.28449672, %v748_v40  ;;  %v833_v40 = vld [vmem:[#allocation14 + $0xa0] sm:$0xff] }
 0x3de   :  { %v750_v42 = vmul.f32 %v749_v41, %v742_v17  ;;  %v817_v41 = vld [vmem:[#allocation14 + $0x20] sm:$0xff] }
 0x3df   :  { %872 = vmatpush.msrb.mxu1 %v817_v41 }
 0x3e0   :  { %v751_v43 = vadd.f32 0.2548296, %v750_v42  ;;  %v832_v42 = vld [vmem:[#allocation14 + $0x98] sm:$0xff] }
 0x3e2   :  { %v752_v44 = vmul.f32 %v751_v43, %v742_v17  ;;  %v852_v17 = vld [vmem:[#allocation14 + $0x138] sm:$0xff] }
 0x3e3   :  { %909 = vmatpush.msra.mxu2 %v852_v17  ;;  %v816_v43 = vld [vmem:[#allocation14 + $0x18] sm:$0xff] }
 0x3e4   :  { %v757_v46 = vmul.f32 %v1078_v45, %v752_v44  ;;  %v831_v44 = vld [vmem:[#allocation14 + $0x90] sm:$0xff]  ;;  %873 = vmatpush.msrb.mxu1 %v816_v43 }
 0x3e5   :  { %910 = vmatpush.msra.mxu2 %v851_v19  ;;  %v815_v45 = vld [vmem:[#allocation14 + $0x10] sm:$0xff] }
 0x3e6   :  { %v758_v47 = vsub.f32 1.0, %v757_v46  ;;  %v830_v46 = vld [vmem:[#allocation14 + $0x88] sm:$0xff]  ;;  %874 = vmatpush.msrb.mxu1 %v815_v45 }
 0x3e7   :  { %911 = vmatpush.msra.mxu2 %v850_v39 }
 0x3e8   :  { %v760_v48 = vsub.f32 0.0, %v758_v47 }
 0x3ea   :  { %v761_v49 = vsel %vm759_vm9, %v758_v47, %v760_v48  ;;  %v814_v47 = vld [vmem:[#allocation14 + $0x8] sm:$0xff]  ;;  %v829_v48 = vld [vmem:[#allocation14 + $0x80] sm:$0xff] }
 0x3eb   :  { %v762_v51 = vadd.f32 1.0, %v761_v49  ;;  %875 = vmatpush.msrb.mxu1 %v814_v47  ;;  %v813_v49 = vld [vmem:[#allocation14] sm:$0xff] }
 0x3ed   :  { %v1548_v52 = vmul.f32 %v762_v51, %v724_v50  ;;  %v849_v50 = vld [vmem:[#allocation14 + $0x120] sm:$0xff]  ;;  %876 = vmatpush.msrb.mxu1 %v813_v49  ;;  %v848_v51 = vld [vmem:[#allocation14 + $0x118] sm:$0xff] }
 0x3ee   :  { %912 = vmatpush.msra.mxu2 %v849_v50 }
 0x3ef   :  { %784 = vmatpush.msrb.mxu0 %v1548_v52  ;;  %956 = vmatpush.msra.mxu1 %v1468_v21 }
 0x3f0   :  { %1054 = vmatmul.msk.f32.vlgmr.msrb.gmra.mxu0 %vm765_vm10, %v764_v53  ;;  %v847_v53 = vld [vmem:[#allocation14 + $0x110] sm:$0xff]  ;;  %913 = vmatpush.msra.mxu2 %v848_v51 }
 0x3f1   :  { %808 = vmatpush.msra.mxu0 %v1548_v52  ;;  %957 = vmatpush.msra.mxu1 %v1470_v22 }
 0x3f2   :  { %914 = vmatpush.msra.mxu2 %v847_v53 }
 0x3f3   :  { %881 = vmatpush.msrb.mxu0 %v844_v54  ;;  %v846_v54 = vld [vmem:[#allocation14 + $0x108] sm:$0xff]  ;;  %958 = vmatpush.msra.mxu1 %v1474_v23 }
 0x3f4   :  { %915 = vmatpush.msra.mxu2 %v846_v54 }
 0x3f5   :  { %882 = vmatpush.msrb.mxu0 %v843_v55  ;;  %v845_v55 = vld [vmem:[#allocation14 + $0x100] sm:$0xff]  ;;  %959 = vmatpush.msra.mxu1 %v1478_v24 }
 0x3f6   :  { %916 = vmatpush.msra.mxu2 %v845_v55 }
 0x3f7   :  { %883 = vmatpush.msrb.mxu0 %v842_v59  ;;  %960 = vmatpush.msra.mxu1 %v1482_v25 }
 0x3f8   :  { %1055 = vmatmul.msk.f32.vlgmr.msra.gmra.mxu0 %vm765_vm10, %v789_v1 }
 0x3f9   :  { %884 = vmatpush.msrb.mxu0 %v841_v63  ;;  %961 = vmatpush.msra.mxu1 %v1486_v26 }
 0x3fb   :  { %885 = vmatpush.msrb.mxu0 %v840_v3  ;;  %962 = vmatpush.msra.mxu1 %v1490_v27 }
 0x3fd   :  { %886 = vmatpush.msrb.mxu0 %v839_v6  ;;  %963 = vmatpush.msra.mxu1 %v1494_v28 }
 0x3ff   :  { %887 = vmatpush.msrb.mxu0 %v838_v9  ;;  %964 = vmatpush.msra.mxu1 %v1500_v29 }
 0x401   :  { %888 = vmatpush.msrb.mxu0 %v837_v12  ;;  %965 = vmatpush.msra.mxu1 %v1504_v30 }
 0x403   :  { %889 = vmatpush.msrb.mxu0 %v836_v15  ;;  %966 = vmatpush.msra.mxu1 %v1508_v31 }
 0x405   :  { %890 = vmatpush.msrb.mxu0 %v835_v18  ;;  %967 = vmatpush.msra.mxu1 %v1512_v32 }
 0x407   :  { %891 = vmatpush.msrb.mxu0 %v834_v37  ;;  %968 = vmatpush.msra.mxu1 %v1516_v33 }
 0x409   :  { %892 = vmatpush.msrb.mxu0 %v833_v40  ;;  %969 = vmatpush.msra.mxu1 %v1520_v34 }
 0x40b   :  { %893 = vmatpush.msrb.mxu0 %v832_v42  ;;  %970 = vmatpush.msra.mxu1 %v1524_v35 }
 0x40d   :  { %894 = vmatpush.msrb.mxu0 %v831_v44  ;;  %971 = vmatpush.msra.mxu1 %v1526_v36 }
 0x40f   :  { %895 = vmatpush.msrb.mxu0 %v830_v46 }
 0x411   :  { %896 = vmatpush.msrb.mxu0 %v829_v48 }
 0x412   :  { %897 = vmatmul.f32.vlgmr.msrb.gmra.mxu0 %v1548_v52 }
 0x46d   :  { %v786_v21 = vpop.f32.mrf.mxu0 }
 0x46e   :  { %877 = vmatmul.f32.vlgmr.msrb.gmra.mxu1 %v786_v21 }
 0x475   :  { %v810_v22 = vpop.f32.mrf.mxu0 }
 0x476   :  { %917 = vmatmul.f32.vlgmr.msra.gmra.mxu2 %v810_v22 }
 0x48f   :  { %v898_v24 = vpop.f32.mrf.mxu0 }
 0x4eb   :  { %v878_v23 = vpop.f32.mrf.mxu1 }
 0x4ec   :  { %v899_v25 = vadd.f32 %v898_v24, %v878_v23 }
 0x4f9   :  { %v918_v26 = vpop.f32.mrf.mxu2 }
 0x4fa   :  { %v919_v27 = vadd.f32 %v918_v26, %v899_v25 }
 0x4fc   :  { %v921_v28 = vrot.slane %v919_v27, 4 }
 0x4fe   :  { %v922_v29 = vadd.f32 %v921_v28, %v919_v27 }
 0x500   :  { %v923_v30 = vrot.slane %v922_v29, 2 }
 0x502   :  { %v924_v31 = vadd.f32 %v923_v30, %v922_v29 }
 0x504   :  { %v925_v32 = vrot.slane %v924_v31, 1 }
 0x506   :  { %v926_v33 = vadd.f32 %v925_v32, %v924_v31 }
 0x508   :  { %943 = vmatmul.f32.vlgmr.msra.gmra.mxu3 %v926_v33 }
 0x58b   :  { %v944_v34 = vpop.f32.mrf.mxu3 }
 0x58c   :  { %v947_v35 = vperm.slane %v944_v34, 0 }
 0x58e   :  { %v948_v52 = vsub.f32 %v919_v27, %v947_v35 }
 0x590   :  { %v949_v56 = vmul.f32 %v948_v52, %v948_v52 }
 0x592   :  { %v950_v36 = vrot.slane %v949_v56, 4 }
 0x594   :  { %v951_v57 = vadd.f32 %v950_v36, %v949_v56 }
 0x596   :  { %v952_v58 = vrot.slane %v951_v57, 2 }
 0x598   :  { %v953_v59 = vadd.f32 %v952_v58, %v951_v57 }
 0x59a   :  { %v954_v60 = vrot.slane %v953_v59, 1 }
 0x59c   :  { %v955_v61 = vadd.f32 %v954_v60, %v953_v59 }
 0x59e   :  { %972 = vmatmul.f32.vlgmr.msra.gmra.mxu1 %v955_v61 }
 0x61b   :  { %v973_v62 = vpop.f32.mrf.mxu1 }
 0x61c   :  { %v974_v63 = vadd.f32 1e-12, %v973_v62 }
 0x61e   :  { %1079 = vrsqrt.f32 %v974_v63  ;;  %vm982_vm12 = vweird.f32 %v974_v63 }
 0x624   :  { %v1080_v0 = vpop.eup %1079 }
 0x625   :  { %v977_v1 = vmul.f32 %v1080_v0, %v974_v63  ;;  %vm983_vm11 = vweird.f32 %v1080_v0 }
 0x626   :  { %vm984_vm13 = vmor %vm982_vm12, %vm983_vm11 }
 0x627   :  { %v978_v2 = vmul.f32 %v1080_v0, %v977_v1 }
 0x629   :  { %v979_v3 = vmul.f32 0.5, %v978_v2 }
 0x62b   :  { %v980_v4 = vsub.f32 1.5, %v979_v3 }
 0x62d   :  { %v981_v5 = vmul.f32 %v1080_v0, %v980_v4 }
 0x62f   :  { %v985_v6 = vsel %vm984_vm13, %v1080_v0, %v981_v5 }
 0x630   :  { %v986_v7 = vperm.slane %v985_v6, 0 }
 0x632   :  { %v987_v8 = vmul.f32 %v986_v7, %v948_v52 }
 0x634   :  { %v989_v9 = vmul.f32 0.70710677, %v987_v8  ;;  %v988_v22 = vmul.f32 0.5, %v987_v8 }
 0x636   :  { %v990_v10 = vand.u32 2147483647, %v989_v9  ;;  %vm1023_vm2 = vcmp.ge.f32.partialorder %v989_v9, 0.0 }
 0x638   :  { %v991_v11 = vmul.f32 0.3275911, %v990_v10  ;;  %v1017_v39 = vsub.f32 0.0, %v990_v10 }
 0x63a   :  { %v992_v12 = vadd.f32 1.0, %v991_v11  ;;  %v1018_v42 = vmul.f32 %v1017_v39, %v990_v10 }
 0x63c   :  { %1081 = vrcp.f32 %v992_v12  ;;  %v1004_v16 = vand.u32 2147483648, %v992_v12  ;;  %v1002_v18 = vand.u32 2147483647, %v992_v12  ;;  %vm998_vm15 = vweird.f32 %v992_v12 }
 0x63d   :  { %v1019_v45 = vmul.f32 1.442695, %v1018_v42 }
 0x63e   :  { %v1005_v19 = vor.u32 1.1754944e-38, %v1004_v16  ;;  %vm1003_vm1 = vcmp.eq.f32.partialorder %v1002_v18, 8.507059e+37 }
 0x63f   :  { %1083 = vpow2.f32 %v1019_v45 }
 0x642   :  { %v1082_v13 = vpop.eup %1081 }
 0x643   :  { %v994_v14 = vmul.f32 %v1082_v13, %v992_v12  ;;  %vm999_vm14 = vweird.f32 %v1082_v13 }
 0x644   :  { %vm1000_vm0 = vmor %vm998_vm15, %vm999_vm14 }
 0x645   :  { %v995_v15 = vsub.f32 1.0, %v994_v14  ;;  %v1084_v51 = vpop.eup %1083 }
 0x647   :  { %v996_v17 = vmul.f32 %v1082_v13, %v995_v15 }
 0x649   :  { %v997_v20 = vadd.f32 %v1082_v13, %v996_v17 }
 0x64b   :  { %v1001_v37 = vsel %vm1000_vm0, %v1082_v13, %v997_v20 }
 0x64c   :  { %v1006_v38 = vsel %vm1003_vm1, %v1005_v19, %v1001_v37 }
 0x64d   :  { %v1008_v40 = vmul.f32 1.0614054, %v1006_v38 }
 0x64f   :  { %v1009_v41 = vadd.f32 -1.4531521, %v1008_v40 }
 0x651   :  { %v1010_v43 = vmul.f32 %v1009_v41, %v1006_v38 }
 0x653   :  { %v1011_v44 = vadd.f32 1.4214138, %v1010_v43 }
 0x655   :  { %v1012_v46 = vmul.f32 %v1011_v44, %v1006_v38 }
 0x657   :  { %v1013_v47 = vadd.f32 -0.28449672, %v1012_v46 }
 0x659   :  { %v1014_v48 = vmul.f32 %v1013_v47, %v1006_v38 }
 0x65b   :  { %v1015_v49 = vadd.f32 0.2548296, %v1014_v48 }
 0x65d   :  { %v1016_v50 = vmul.f32 %v1015_v49, %v1006_v38 }
 0x65f   :  { %v1021_v53 = vmul.f32 %v1084_v51, %v1016_v50 }
 0x661   :  { %v1022_v54 = vsub.f32 1.0, %v1021_v53 }
 0x663   :  { %v1024_v55 = vsub.f32 0.0, %v1022_v54 }
 0x665   :  { %v1025_v21 = vsel %vm1023_vm2, %v1022_v54, %v1024_v55 }
 0x666   :  { %v1026_v23 = vadd.f32 1.0, %v1025_v21 }
 0x668   :  { %v1027_v24 = vmul.f32 %v1026_v23, %v988_v22 }
 0x66a   :  { %1028 = vst [vmem:[#allocation17] sm:$0xff] %v1027_v24 }
 0x66b   :  { %1039 = dma.vmem_to_hbm [thread:$0]  %s1035_s30, 128, %s1037_s11, [#allocation4]  }
 0x66c   :  { %1335 = dma.done.wait [#allocation4], 128  }
 0x66d   :  { %1336 = vsyncadd [#allocation4], 4294967168 }
 0x66e   :  { %1044 = vsyncpa [#allocation3], 1 }
 0x66f   :  { %1045 = vsyncpa [#allocation6], 1 }
 0x670   :  { %1046 = vsyncpa [#allocation9], 1 }
 0x671   :  { %1047 = vsyncpa [#allocation12], 1 }
 0x672   :  { %1048 = vsyncpa [#allocation15], 1 }
 0x673   :  { %1049 = vsyncpa [#allocation4], 1 }

</bundles_post_ra>
